<compile_context>
chip_gen: v5e
topology: v5e:2x2
jax: 0.10.0
libtpu: 0.0.40
codegen_flags: <defaults>
</compile_context>

<pallas_src>
import math

import jax
import jax.numpy as jnp
from jax.experimental import pallas as pl
from jax.experimental.pallas import tpu as pltpu

DIM = 32          # dim_model
HEADS = 4         # heads_en
DK = DIM // HEADS
SEQ = 8           # seq_len
BATCH = 2
TOTAL_EX = 10
TOTAL_CAT = 6
EPS = 1e-5        # PyTorch nn.LayerNorm default

# MXU operand dtype. Set to jnp.bfloat16 at production d_model (>=128); kept f32 at the
# tiny validation shapes where the MXU is not the bottleneck and exactness matters.
MXU_DTYPE = jnp.float32

# Row indices inside the packed (8, d) vector slab (LayerNorm params + small biases).
_LN1_G, _LN1_B, _BO, _LN2_G, _LN2_B, _B1, _B2 = range(7)


def _round_up(v, m):
    return (v + m - 1) // m * m


def _make_encoder_kernel(bs, n, d, heads):
    dk = d // heads
    bn = bs * n
    scale = 1.0 / math.sqrt(dk)

    def kernel(ids_ref, pos_ref, tab_ref, mbias_ref, wqkv_ref, bqkv_ref,
               wrest_ref, vec_ref, o_ref):
        f32 = jnp.float32

        def mx(a):                       # cast MXU operands (no-op while MXU_DTYPE=f32)
            return a.astype(MXU_DTYPE)

        # ---- fused embedding lookup + sum + positional add -------------------------
        # ids col 0 = exercise id, col 1 = category id + v_ex (offset applied wrapper-side),
        # so one one-hot row selects BOTH table rows -> a single (bn,V)@(V,d) matmul.
        ids = ids_ref[...]                                           # (bn, 2) int32
        V = tab_ref.shape[0]
        iota_v = jax.lax.broadcasted_iota(jnp.int32, (bn, V), 1)
        onehot = ((ids[:, 0:1] == iota_v) | (ids[:, 1:2] == iota_v)).astype(f32)
        x = jnp.dot(mx(onehot), tab_ref[...],
                    preferred_element_type=f32) + pos_ref[...].astype(f32)

        vec = vec_ref[...].astype(f32)                               # (8, d)

        def row(i):                                                  # (1, d) sublane slice
            return vec[i:i + 1, :]

        def layer_norm(v, g, b):
            # two-pass variance: matches nn.LayerNorm / the reference exactly.
            mu = jnp.mean(v, axis=-1, keepdims=True)
            cv = v - mu
            var = jnp.mean(cv * cv, axis=-1, keepdims=True)
            return cv * jax.lax.rsqrt(var + EPS) * g + b

        # ---- LayerNorm1 (skip connection source) ------------------------------------
        h = layer_norm(x, row(_LN1_G), row(_LN1_B))

        # ---- fused QKV projection: single (bn,d)@(d,3d) MXU issue + packed bias row --
        qkv = jnp.dot(mx(h), wqkv_ref[...], preferred_element_type=f32) + bqkv_ref[...]

        # ---- ONE head-major relayout (instead of 12 per-head 8-lane slices + 4 .T) ---
        qkvh = jnp.transpose(qkv.reshape(bn, 3 * heads, dk), (1, 0, 2))  # (3H, bn, dk)
        q3 = qkvh[0:heads] * scale                                       # (H, bn, dk)
        k3 = qkvh[heads:2 * heads]
        v3 = qkvh[2 * heads:3 * heads]

        # ---- causal self-attention, all heads at once; host-precomputed additive mask
        s = jnp.einsum("hqd,hkd->hqk", mx(q3), mx(k3),
                       preferred_element_type=f32)                       # (H, bn, bn)
        s = s + mbias_ref[...]                       # 0 where allowed, -1e9 elsewhere
        s = s - jnp.max(s, axis=-1, keepdims=True)
        e = jnp.exp(s)
        p = e / jnp.sum(e, axis=-1, keepdims=True)   # exact normalization (no approx vrcp)
        ctx = jnp.einsum("hqk,hkd->hqd", mx(p), mx(v3),
                         preferred_element_type=f32)                     # (H, bn, dk)

        # back to token-major; head-concat order matches the Wo row blocks.
        ctx2 = jnp.transpose(ctx, (1, 0, 2)).reshape(bn, d)

        wrest = wrest_ref[...]                       # (3d, d): rows [Wo; W1; W2]
        attn = jnp.dot(mx(ctx2), wrest[0:d, :],
                       preferred_element_type=f32) + row(_BO)
        m = attn + h                                 # dropout1 == identity

        # ---- LayerNorm2 + FFN + residual ---------------------------------------------
        h2 = layer_norm(m, row(_LN2_G), row(_LN2_B))
        f = jnp.dot(mx(h2), wrest[d:2 * d, :], preferred_element_type=f32) + row(_B1)
        f = jnp.maximum(f, 0.0)
        f = jnp.dot(mx(f), wrest[2 * d:3 * d, :], preferred_element_type=f32) + row(_B2)
        o_ref[...] = (f + h2).astype(o_ref.dtype)    # dropout2 == identity

    return kernel


def encoder_block_pallas(in_ex, in_cat, in_pos, ex_table, cat_table, params, heads=HEADS):
    """Forward of Encoder_block (first_block=True, eval mode) as one Pallas kernel."""
    (ln1_g, ln1_b, wq, bq, wk, bk, wv, bv, wo, bo,
     ln2_g, ln2_b, w1, b1, w2, b2) = params
    bs, n = in_ex.shape
    d = in_pos.shape[-1]
    bn = bs * n

    # ---- wrapper-side packing (in production this is done once at parameter load) ----
    v_ex = _round_up(ex_table.shape[0], 8)
    v_cat = _round_up(cat_table.shape[0], 8)
    tab = jnp.zeros((v_ex + v_cat, d), jnp.float32)
    tab = tab.at[:ex_table.shape[0]].set(ex_table)
    tab = tab.at[v_ex:v_ex + cat_table.shape[0]].set(cat_table)

    ids = jnp.stack([in_ex.reshape(bn).astype(jnp.int32),
                     in_cat.reshape(bn).astype(jnp.int32) + v_ex], axis=1)   # (bn, 2)

    # Host-precomputed additive attention mask: same sequence AND causal, else -1e9.
    r = jnp.arange(bn)
    allowed = ((r[:, None] // n) == (r[None, :] // n)) & (r[None, :] <= r[:, None])
    mbias = jnp.where(allowed, 0.0, -1e9).astype(jnp.float32)                # (bn, bn)

    wqkv = jnp.concatenate([wq, wk, wv], axis=1).astype(MXU_DTYPE)           # (d, 3d)
    bqkv = jnp.concatenate([bq, bk, bv], axis=1).astype(jnp.float32)         # (1, 3d)
    wrest = jnp.concatenate([wo, w1, w2], axis=0).astype(MXU_DTYPE)          # (3d, d)
    vecs = jnp.concatenate([ln1_g, ln1_b, bo, ln2_g, ln2_b, b1, b2,
                            jnp.zeros((1, d), jnp.float32)], axis=0)         # (8, d)

    kernel = _make_encoder_kernel(bs, n, d, heads)
    out = pl.pallas_call(
        kernel,
        out_shape=jax.ShapeDtypeStruct((bn, d), jnp.float32),
        # Single grid-less program, everything resident in VMEM (bs*n = 16 rows).
        in_specs=[pl.BlockSpec(memory_space=pltpu.MemorySpace.VMEM)] * 8,
        out_specs=pl.BlockSpec(memory_space=pltpu.MemorySpace.VMEM),
    )(ids, in_pos.reshape(bn, d), tab.astype(MXU_DTYPE), mbias,
      wqkv, bqkv, wrest, vecs)
    return out.reshape(bs, n, d)


# ---------------- pure-JAX reference (module semantics, for correctness check) ----------
def encoder_block_ref(x, params):
    (ln1_g, ln1_b, wq, bq, wk, bk, wv, bv, wo, bo,
     ln2_g, ln2_b, w1, b1, w2, b2) = params

    def ln(v, g, b):
        mu = jnp.mean(v, axis=-1, keepdims=True)
        var = jnp.mean((v - mu) ** 2, axis=-1, keepdims=True)
        return (v - mu) / jnp.sqrt(var + EPS) * g + b

    h = ln(x, ln1_g, ln1_b)
    skip = h
    bs, n, d = h.shape
    q = (h @ wq + bq).reshape(bs, n, HEADS, DK).transpose(0, 2, 1, 3)
    k = (h @ wk + bk).reshape(bs, n, HEADS, DK).transpose(0, 2, 1, 3)
    v = (h @ wv + bv).reshape(bs, n, HEADS, DK).transpose(0, 2, 1, 3)
    s = jnp.einsum("bhqd,bhkd->bhqk", q, k) / math.sqrt(DK)
    causal = jnp.tril(jnp.ones((n, n), dtype=bool))
    s = jnp.where(causal, s, -1e9)
    p = jax.nn.softmax(s, axis=-1)
    ctx = jnp.einsum("bhqk,bhkd->bhqd", p, v).transpose(0, 2, 1, 3).reshape(bs, n, d)
    m = (ctx @ wo + bo) + skip
    h2 = ln(m, ln2_g, ln2_b)
    f = jnp.maximum(h2 @ w1 + b1, 0.0) @ w2 + b2
    return f + h2


if __name__ == "__main__":
    key = jax.random.PRNGKey(0)
    ks = jax.random.split(key, 16)

    # Deterministic synthetic parameters (shapes from Encoder_block.__init__).
    ex_table = 0.1 * jax.random.normal(ks[0], (TOTAL_EX + 2, DIM), jnp.float32)
    cat_table = 0.1 * jax.random.normal(ks[1], (TOTAL_CAT + 2, DIM), jnp.float32)

    def lin(k, din, dout):
        kw, kb = jax.random.split(k)
        w = jax.random.normal(kw, (din, dout), jnp.float32) / math.sqrt(din)
        b = 0.01 * jax.random.normal(kb, (1, dout), jnp.float32)
        return w, b

    ln1_g = jnp.ones((1, DIM), jnp.float32)
    ln1_b = jnp.zeros((1, DIM), jnp.float32)
    ln2_g = jnp.ones((1, DIM), jnp.float32)
    ln2_b = jnp.zeros((1, DIM), jnp.float32)
    wq, bq = lin(ks[2], DIM, DIM)
    wk, bk = lin(ks[3], DIM, DIM)
    wv, bv = lin(ks[4], DIM, DIM)
    wo, bo = lin(ks[5], DIM, DIM)
    w1, b1 = lin(ks[6], DIM, DIM)   # transformer_FFN: Linear(d,d) -> ReLU -> Linear(d,d)
    w2, b2 = lin(ks[7], DIM, DIM)

    params = [ln1_g, ln1_b, wq, bq, wk, bk, wv, bv, wo, bo,
              ln2_g, ln2_b, w1, b1, w2, b2]

    # Inputs (first_block=True path): integer ids + positional embedding tensor.
    in_ex = jax.random.randint(ks[8], (BATCH, SEQ), 0, TOTAL_EX + 2)
    in_cat = jax.random.randint(ks[9], (BATCH, SEQ), 0, TOTAL_CAT + 2)
    in_pos = 0.1 * jax.random.normal(ks[10], (BATCH, SEQ, DIM), jnp.float32)

    out = encoder_block_pallas(in_ex, in_cat, in_pos, ex_table, cat_table, params)
    out = jax.block_until_ready(out)

    # Reference computes the embedding sum with plain-JAX gathers; the kernel fuses it.
    x = jnp.take(ex_table, in_ex, axis=0) + jnp.take(cat_table, in_cat, axis=0) + in_pos
    ref = encoder_block_ref(x, params)

    assert out.shape == (BATCH, SEQ, DIM)
    # Full-f32 path with exact softmax normalization and two-pass LayerNorm variance:
    # only f32 accumulation-order differences remain.
    assert jnp.allclose(out, ref, atol=1e-3, rtol=1e-3), "mismatch vs. reference"

    print("KERNEL_OK")
</pallas_src>

<mosaic_0001>
module attributes {stable_mosaic.version = 11 : i64} {
  func.func @kernel(%arg0: memref<16x2xi32, #tpu.memory_space<vmem>>, %arg1: memref<16x32xf32, #tpu.memory_space<vmem>>, %arg2: memref<24x32xf32, #tpu.memory_space<vmem>>, %arg3: memref<16x16xf32, #tpu.memory_space<vmem>>, %arg4: memref<32x96xf32, #tpu.memory_space<vmem>>, %arg5: memref<1x96xf32, #tpu.memory_space<vmem>>, %arg6: memref<96x32xf32, #tpu.memory_space<vmem>>, %arg7: memref<8x32xf32, #tpu.memory_space<vmem>>, %arg8: memref<16x32xf32, #tpu.memory_space<vmem>>) attributes {dimension_semantics = [], scalar_prefetch = 0 : i64, scratch_operands = 0 : i64, tpu.core_type = #tpu.core_type<tc>} {
    %c0 = arith.constant 0 : index
    %c0_0 = arith.constant 0 : index
    %0 = vector.load %arg0[%c0, %c0_0] : memref<16x2xi32, #tpu.memory_space<vmem>>, vector<16x2xi32>
    %1 = tpu.iota {dimensions = array<i32: 1>} : vector<16x24xi32>
    %2 = vector.extract_strided_slice %0 {offsets = [0, 0], sizes = [16, 1], strides = [1, 1]} : vector<16x2xi32> to vector<16x1xi32>
    %3 = vector.broadcast %2 : vector<16x1xi32> to vector<16x24xi32>
    %4 = arith.cmpi eq, %3, %1 : vector<16x24xi32>
    %5 = vector.extract_strided_slice %0 {offsets = [0, 1], sizes = [16, 1], strides = [1, 1]} : vector<16x2xi32> to vector<16x1xi32>
    %6 = vector.broadcast %5 : vector<16x1xi32> to vector<16x24xi32>
    %7 = arith.cmpi eq, %6, %1 : vector<16x24xi32>
    %8 = arith.ori %4, %7 : vector<16x24xi1>
    %9 = arith.extui %8 : vector<16x24xi1> to vector<16x24xi32>
    %10 = arith.sitofp %9 : vector<16x24xi32> to vector<16x24xf32>
    %c0_1 = arith.constant 0 : index
    %c0_2 = arith.constant 0 : index
    %11 = vector.load %arg2[%c0_1, %c0_2] : memref<24x32xf32, #tpu.memory_space<vmem>>, vector<24x32xf32>
    %cst = arith.constant dense<0.000000e+00> : vector<16x32xf32>
    %12 = tpu.matmul %10, %11, %cst {dimension_numbers = #tpu.dot_dimension_numbers<[1], [0], [0], [1], [0, 0, 1, 1], [], []>} : vector<16x24xf32>, vector<24x32xf32>, vector<16x32xf32> -> vector<16x32xf32>
    %c0_3 = arith.constant 0 : index
    %c0_4 = arith.constant 0 : index
    %13 = vector.load %arg1[%c0_3, %c0_4] : memref<16x32xf32, #tpu.memory_space<vmem>>, vector<16x32xf32>
    %14 = arith.addf %12, %13 : vector<16x32xf32>
    %c0_5 = arith.constant 0 : index
    %c0_6 = arith.constant 0 : index
    %15 = vector.load %arg7[%c0_5, %c0_6] : memref<8x32xf32, #tpu.memory_space<vmem>>, vector<8x32xf32>
    %16 = vector.extract_strided_slice %15 {offsets = [0, 0], sizes = [1, 32], strides = [1, 1]} : vector<8x32xf32> to vector<1x32xf32>
    %17 = vector.extract_strided_slice %15 {offsets = [1, 0], sizes = [1, 32], strides = [1, 1]} : vector<8x32xf32> to vector<1x32xf32>
    %cst_7 = arith.constant dense<0.000000e+00> : vector<16xf32>
    %18 = vector.multi_reduction <add>, %14, %cst_7 [1] : vector<16x32xf32> to vector<16xf32>
    %19 = vector.shape_cast %18 : vector<16xf32> to vector<16x1xf32>
    %cst_8 = arith.constant 3.200000e+01 : f32
    %20 = vector.broadcast %cst_8 : f32 to vector<16x1xf32>
    %21 = arith.divf %19, %20 : vector<16x1xf32>
    %22 = vector.broadcast %21 : vector<16x1xf32> to vector<16x32xf32>
    %23 = arith.subf %14, %22 : vector<16x32xf32>
    %24 = arith.mulf %23, %23 : vector<16x32xf32>
    %cst_9 = arith.constant dense<0.000000e+00> : vector<16xf32>
    %25 = vector.multi_reduction <add>, %24, %cst_9 [1] : vector<16x32xf32> to vector<16xf32>
    %26 = vector.shape_cast %25 : vector<16xf32> to vector<16x1xf32>
    %cst_10 = arith.constant 3.200000e+01 : f32
    %27 = vector.broadcast %cst_10 : f32 to vector<16x1xf32>
    %28 = arith.divf %26, %27 : vector<16x1xf32>
    %cst_11 = arith.constant 9.99999974E-6 : f32
    %29 = vector.broadcast %cst_11 : f32 to vector<16x1xf32>
    %30 = arith.addf %28, %29 : vector<16x1xf32>
    %31 = math.rsqrt %30 : vector<16x1xf32>
    %32 = vector.broadcast %31 : vector<16x1xf32> to vector<16x32xf32>
    %33 = arith.mulf %23, %32 : vector<16x32xf32>
    %34 = vector.broadcast %16 : vector<1x32xf32> to vector<16x32xf32>
    %35 = arith.mulf %33, %34 : vector<16x32xf32>
    %36 = vector.broadcast %17 : vector<1x32xf32> to vector<16x32xf32>
    %37 = arith.addf %35, %36 : vector<16x32xf32>
    %c0_12 = arith.constant 0 : index
    %c0_13 = arith.constant 0 : index
    %38 = vector.load %arg4[%c0_12, %c0_13] : memref<32x96xf32, #tpu.memory_space<vmem>>, vector<32x96xf32>
    %cst_14 = arith.constant dense<0.000000e+00> : vector<16x96xf32>
    %39 = tpu.matmul %37, %38, %cst_14 {dimension_numbers = #tpu.dot_dimension_numbers<[1], [0], [0], [1], [0, 0, 1, 1], [], []>} : vector<16x32xf32>, vector<32x96xf32>, vector<16x96xf32> -> vector<16x96xf32>
    %c0_15 = arith.constant 0 : index
    %c0_16 = arith.constant 0 : index
    %40 = vector.load %arg5[%c0_15, %c0_16] : memref<1x96xf32, #tpu.memory_space<vmem>>, vector<1x96xf32>
    %41 = vector.broadcast %40 : vector<1x96xf32> to vector<16x96xf32>
    %42 = arith.addf %39, %41 : vector<16x96xf32>
    %43 = vector.shape_cast %42 : vector<16x96xf32> to vector<16x12x8xf32>
    %44 = tpu.transpose %43, [1, 0, 2] : vector<16x12x8xf32> -> vector<12x16x8xf32>
    %45 = vector.extract_strided_slice %44 {offsets = [0, 0, 0], sizes = [4, 16, 8], strides = [1, 1, 1]} : vector<12x16x8xf32> to vector<4x16x8xf32>
    %cst_17 = arith.constant 0.353553385 : f32
    %46 = vector.broadcast %cst_17 : f32 to vector<4x16x8xf32>
    %47 = arith.mulf %45, %46 : vector<4x16x8xf32>
    %48 = vector.extract_strided_slice %44 {offsets = [4, 0, 0], sizes = [4, 16, 8], strides = [1, 1, 1]} : vector<12x16x8xf32> to vector<4x16x8xf32>
    %49 = vector.extract_strided_slice %44 {offsets = [8, 0, 0], sizes = [4, 16, 8], strides = [1, 1, 1]} : vector<12x16x8xf32> to vector<4x16x8xf32>
    "tpu.trace_start"() <{level = 10 : i32, message = "hqd,hkd->hqk"}> : () -> ()
    %cst_18 = arith.constant dense<0.000000e+00> : vector<4x16x16xf32>
    %50 = tpu.matmul %47, %48, %cst_18 {dimension_numbers = #tpu.dot_dimension_numbers<[2], [2], [1], [1], [0, 0, 0, 1, 1, 1], [0], [0]>} : vector<4x16x8xf32>, vector<4x16x8xf32>, vector<4x16x16xf32> -> vector<4x16x16xf32>
    "tpu.trace_stop"() : () -> ()
    %c0_19 = arith.constant 0 : index
    %c0_20 = arith.constant 0 : index
    %51 = vector.load %arg3[%c0_19, %c0_20] : memref<16x16xf32, #tpu.memory_space<vmem>>, vector<16x16xf32>
    %52 = vector.shape_cast %51 : vector<16x16xf32> to vector<1x16x16xf32>
    %53 = vector.broadcast %52 : vector<1x16x16xf32> to vector<4x16x16xf32>
    %54 = arith.addf %50, %53 : vector<4x16x16xf32>
    %cst_21 = arith.constant dense<0xFF800000> : vector<4x16xf32>
    %55 = vector.multi_reduction <maximumf>, %54, %cst_21 [2] : vector<4x16x16xf32> to vector<4x16xf32>
    %56 = vector.shape_cast %55 : vector<4x16xf32> to vector<4x16x1xf32>
    %57 = vector.broadcast %56 : vector<4x16x1xf32> to vector<4x16x16xf32>
    %58 = arith.subf %54, %57 : vector<4x16x16xf32>
    %59 = math.exp %58 : vector<4x16x16xf32>
    %cst_22 = arith.constant dense<0.000000e+00> : vector<4x16xf32>
    %60 = vector.multi_reduction <add>, %59, %cst_22 [2] : vector<4x16x16xf32> to vector<4x16xf32>
    %61 = vector.shape_cast %60 : vector<4x16xf32> to vector<4x16x1xf32>
    %62 = vector.broadcast %61 : vector<4x16x1xf32> to vector<4x16x16xf32>
    %63 = arith.divf %59, %62 : vector<4x16x16xf32>
    "tpu.trace_start"() <{level = 10 : i32, message = "hqk,hkd->hqd"}> : () -> ()
    %cst_23 = arith.constant dense<0.000000e+00> : vector<4x16x8xf32>
    %64 = tpu.matmul %63, %49, %cst_23 {dimension_numbers = #tpu.dot_dimension_numbers<[2], [1], [1], [2], [0, 0, 0, 1, 1, 2], [0], [0]>} : vector<4x16x16xf32>, vector<4x16x8xf32>, vector<4x16x8xf32> -> vector<4x16x8xf32>
    "tpu.trace_stop"() : () -> ()
    %65 = tpu.transpose %64, [1, 0, 2] : vector<4x16x8xf32> -> vector<16x4x8xf32>
    %66 = vector.shape_cast %65 : vector<16x4x8xf32> to vector<16x32xf32>
    %c0_24 = arith.constant 0 : index
    %c0_25 = arith.constant 0 : index
    %67 = vector.load %arg6[%c0_24, %c0_25] : memref<96x32xf32, #tpu.memory_space<vmem>>, vector<96x32xf32>
    %68 = vector.extract_strided_slice %67 {offsets = [0, 0], sizes = [32, 32], strides = [1, 1]} : vector<96x32xf32> to vector<32x32xf32>
    %cst_26 = arith.constant dense<0.000000e+00> : vector<16x32xf32>
    %69 = tpu.matmul %66, %68, %cst_26 {dimension_numbers = #tpu.dot_dimension_numbers<[1], [0], [0], [1], [0, 0, 1, 1], [], []>} : vector<16x32xf32>, vector<32x32xf32>, vector<16x32xf32> -> vector<16x32xf32>
    %70 = vector.extract_strided_slice %15 {offsets = [2, 0], sizes = [1, 32], strides = [1, 1]} : vector<8x32xf32> to vector<1x32xf32>
    %71 = vector.broadcast %70 : vector<1x32xf32> to vector<16x32xf32>
    %72 = arith.addf %69, %71 : vector<16x32xf32>
    %73 = arith.addf %72, %37 : vector<16x32xf32>
    %74 = vector.extract_strided_slice %15 {offsets = [3, 0], sizes = [1, 32], strides = [1, 1]} : vector<8x32xf32> to vector<1x32xf32>
    %75 = vector.extract_strided_slice %15 {offsets = [4, 0], sizes = [1, 32], strides = [1, 1]} : vector<8x32xf32> to vector<1x32xf32>
    %cst_27 = arith.constant dense<0.000000e+00> : vector<16xf32>
    %76 = vector.multi_reduction <add>, %73, %cst_27 [1] : vector<16x32xf32> to vector<16xf32>
    %77 = vector.shape_cast %76 : vector<16xf32> to vector<16x1xf32>
    %cst_28 = arith.constant 3.200000e+01 : f32
    %78 = vector.broadcast %cst_28 : f32 to vector<16x1xf32>
    %79 = arith.divf %77, %78 : vector<16x1xf32>
    %80 = vector.broadcast %79 : vector<16x1xf32> to vector<16x32xf32>
    %81 = arith.subf %73, %80 : vector<16x32xf32>
    %82 = arith.mulf %81, %81 : vector<16x32xf32>
    %cst_29 = arith.constant dense<0.000000e+00> : vector<16xf32>
    %83 = vector.multi_reduction <add>, %82, %cst_29 [1] : vector<16x32xf32> to vector<16xf32>
    %84 = vector.shape_cast %83 : vector<16xf32> to vector<16x1xf32>
    %cst_30 = arith.constant 3.200000e+01 : f32
    %85 = vector.broadcast %cst_30 : f32 to vector<16x1xf32>
    %86 = arith.divf %84, %85 : vector<16x1xf32>
    %cst_31 = arith.constant 9.99999974E-6 : f32
    %87 = vector.broadcast %cst_31 : f32 to vector<16x1xf32>
    %88 = arith.addf %86, %87 : vector<16x1xf32>
    %89 = math.rsqrt %88 : vector<16x1xf32>
    %90 = vector.broadcast %89 : vector<16x1xf32> to vector<16x32xf32>
    %91 = arith.mulf %81, %90 : vector<16x32xf32>
    %92 = vector.broadcast %74 : vector<1x32xf32> to vector<16x32xf32>
    %93 = arith.mulf %91, %92 : vector<16x32xf32>
    %94 = vector.broadcast %75 : vector<1x32xf32> to vector<16x32xf32>
    %95 = arith.addf %93, %94 : vector<16x32xf32>
    %96 = vector.extract_strided_slice %67 {offsets = [32, 0], sizes = [32, 32], strides = [1, 1]} : vector<96x32xf32> to vector<32x32xf32>
    %cst_32 = arith.constant dense<0.000000e+00> : vector<16x32xf32>
    %97 = tpu.matmul %95, %96, %cst_32 {dimension_numbers = #tpu.dot_dimension_numbers<[1], [0], [0], [1], [0, 0, 1, 1], [], []>} : vector<16x32xf32>, vector<32x32xf32>, vector<16x32xf32> -> vector<16x32xf32>
    %98 = vector.extract_strided_slice %15 {offsets = [5, 0], sizes = [1, 32], strides = [1, 1]} : vector<8x32xf32> to vector<1x32xf32>
    %99 = vector.broadcast %98 : vector<1x32xf32> to vector<16x32xf32>
    %100 = arith.addf %97, %99 : vector<16x32xf32>
    %cst_33 = arith.constant 0.000000e+00 : f32
    %101 = vector.broadcast %cst_33 : f32 to vector<16x32xf32>
    %102 = arith.maximumf %100, %101 : vector<16x32xf32>
    %103 = vector.extract_strided_slice %67 {offsets = [64, 0], sizes = [32, 32], strides = [1, 1]} : vector<96x32xf32> to vector<32x32xf32>
    %cst_34 = arith.constant dense<0.000000e+00> : vector<16x32xf32>
    %104 = tpu.matmul %102, %103, %cst_34 {dimension_numbers = #tpu.dot_dimension_numbers<[1], [0], [0], [1], [0, 0, 1, 1], [], []>} : vector<16x32xf32>, vector<32x32xf32>, vector<16x32xf32> -> vector<16x32xf32>
    %105 = vector.extract_strided_slice %15 {offsets = [6, 0], sizes = [1, 32], strides = [1, 1]} : vector<8x32xf32> to vector<1x32xf32>
    %106 = vector.broadcast %105 : vector<1x32xf32> to vector<16x32xf32>
    %107 = arith.addf %104, %106 : vector<16x32xf32>
    %108 = arith.addf %107, %95 : vector<16x32xf32>
    %c0_35 = arith.constant 0 : index
    %c0_36 = arith.constant 0 : index
    %109 = vector.load %arg8[%c0_35, %c0_36] : memref<16x32xf32, #tpu.memory_space<vmem>>, vector<16x32xf32>
    tpu.vector_store %arg8[%c0_35, %c0_36], %108 {strides = array<i32>} : memref<16x32xf32, #tpu.memory_space<vmem>>, vector<16x32xf32>,
    return
  }
}

</mosaic_0001>

<bundles_post_ra>
// kernel: tpu_custom_call.1
= control target key start
LH: loop header
LB: loop body
LE: loop exit
PB: predicated region body
PF: predicated region fallthrough
CT: control target
= control target key end

     0   :  { %v1967_v2 = vmov 0   ;;  %s2730_s0 = inlined_call_operand.vmem [shape: s32[16,2], index: 0, kind: input, shape index: {}]   ;;  %s2731_s1 = inlined_call_operand.vmem [shape: f32[16,32], index: 1, kind: input, shape index: {}]   ;;  %s2732_s2 = inlined_call_operand.vmem [shape: f32[24,32], index: 2, kind: input, shape index: {}]   ;;  %s2733_s3 = inlined_call_operand.vmem [shape: f32[16,16], index: 3, kind: input, shape index: {}]   ;;  %s2734_s4 = inlined_call_operand.vmem [shape: f32[32,96], index: 4, kind: input, shape index: {}]   ;;  %s2735_s5 = inlined_call_operand.vmem [shape: f32[1,96], index: 5, kind: input, shape index: {}]   ;;  %s2736_s6 = inlined_call_operand.vmem [shape: f32[96,32], index: 6, kind: input, shape index: {}]   ;;  %s2737_s7 = inlined_call_operand.vmem [shape: f32[8,32], index: 7, kind: input, shape index: {}]   ;;  %s2738_s8 = inlined_call_operand.hbm [shape: f32[16,32], index: 8, kind: output, shape index: {}]  }
   0x1   :  { %v30_v0 = vld [vmem:[%s2730_s0] sm:$0xff]  ;;  %v31_v1 = vld [vmem:[%s2730_s0 + $0x8] sm:$0xff]  ;;  %1873 = vset.pattern.permute.xlu0 %v1967_v2  ;;  %1875 = vset.pattern.permute.xlu1 %v1967_v2 }
   0x2   :  { %13 = vsyncpa [#allocation3], 0  ;;  %35 = vperm.xlu0 %1873, %v30_v0   ;;  %38 = vperm.xlu1 %1875, %v31_v1   ;;  %v1968_v3 = vmov 1   ;;  %v58_v4 = vld [vmem:[%s2732_s2 + $0x10] sm:$0xff]  ;;  %v57_v5 = vld [vmem:[%s2732_s2 + $0x8] sm:$0xff]  ;;  %v32_v9 = vlaneseq  ;;  %vm61_vm3 = vcmask 195584  }
   0x3   :  { %81 = vmatpush.msra.mxu0 %v58_v4  ;;  %1848 = vmatpush.msra.mxu1 %v58_v4  ;;  %v56_v6 = vld [vmem:[%s2732_s2] sm:$0xff]  ;;  %v1969_v13 = vmov 0.0   ;;  %vm92_vm7 = vcmask 261120   ;;  %v60_v19 = vld [vmem:[%s2731_s1 + $0x8] sm:$0xff]  ;;  %v1970_v24 = vmov 32.0   ;;  %v153_v41 = vld [vmem:[%s2734_s4 + $0x18] sm:$0xff] }
   0x4   :  { %v33_v10 = vand.u32 127, %v32_v9  ;;  %v59_v16 = vld [vmem:[%s2731_s1] sm:$0xff]  ;;  %1898 = vrcp.f32 %v1970_v24  ;;  %v152_v42 = vld [vmem:[%s2734_s4 + $0x10] sm:$0xff]  ;;  %v151_v43 = vld [vmem:[%s2734_s4 + $0x8] sm:$0xff]  ;;  %s1971_s27 = smov 88   ;;  %s1972_s28 = smov 120  }
   0x5   :  { %82 = vmatpush.msra.mxu0 %v57_v5  ;;  %1849 = vmatpush.msra.mxu1 %v57_v5  ;;  %v150_v44 = vld [vmem:[%s2734_s4] sm:$0xff]  ;;  %s1973_s29 = smov 104   ;;  %s1974_s30 = smov 96   ;;  %vm256_vm15 = vcmask 1047556  }
   0x6   :  { %v91_v56 = vld [vmem:[%s2737_s7] sm:$0xff]  ;;  %s1975_s9 = smov 112   ;;  %s1977_s10 = smov 80  }
   0x7   :  { %83 = vmatpush.msra.mxu0 %v56_v6  ;;  %1850 = vmatpush.msra.mxu1 %v56_v6  ;;  %v144_v60 = vperm.slane %v91_v56, 0  ;;  %s1981_s2 = smov 40   ;;  %s1982_s14 = smov 64  }
   0x8   :  { %s1983_s15 = smov 48   ;;  %s1984_s16 = smov 24  }
   0x9   :  { %176 = vmatpush.msrb.mxu1 %v153_v41  ;;  %v1979_v41 = vmov 1934713408   ;;  %s1985_s1 = smov 16   ;;  %s1986_s17 = smov 8  }
   0xa   :  { %1874 = vset.pattern.permute.xlu0 %v1968_v3  ;;  %1876 = vset.pattern.permute.xlu1 %v1968_v3  ;;  %v1899_v25 = vpop.eup %1898  ;;  %s1987_s18 = smov [#allocation2]   ;;  %s1988_s20 = smov 128  }
   0xb   :  { %43 = vperm.xlu0 %1874, %v30_v0   ;;  %46 = vperm.xlu1 %1876, %v31_v1   ;;  %v100_v26 = vmul.f32 32.0, %v1899_v25  ;;  %vm104_vm8 = vweird.f32 %v1899_v25  ;;  %v147_v0 = vperm.slane %v91_v56, 1  ;;  %s1798_s19 = sshll.u32 %s1987_s18, 4  ;;  %s1799_s19 = int_to_ptr.vmem [resolvable:$true] %s1798_s19 }
   0xc   :  { %177 = vmatpush.msrb.mxu1 %v152_v42  ;;  %v309_v42 = vunpack.c.l.s4 %v1979_v41 }
   0xd   :  { %v101_v27 = vsub.f32 1.0, %v100_v26 }
   0xe   :  { %178 = vmatpush.msrb.mxu1 %v151_v43 }
   0xf   :  { %v102_v28 = vmul.f32 %v1899_v25, %v101_v27 }
  0x10   :  { %179 = vmatpush.msrb.mxu1 %v150_v44 }
  0x11   :  { %v103_v29 = vadd.f32 %v1899_v25, %v102_v28 }
  0x13   :  { %v2059_v30 = vsel %vm104_vm8, %v1899_v25, %v103_v29 }
  0x74   :  { %v36_v7 = vpop.permute.xlu0 %35  ;;  %v39_v8 = vpop.permute.xlu1 %38 }
  0x75   :  { %vm41_vm0 = vcmp.eq.s32.totalorder %v39_v8, %v33_v10  ;;  %vm40_vm1 = vcmp.eq.s32.totalorder %v36_v7, %v33_v10 }
  0x7d   :  { %v44_v11 = vpop.permute.xlu0 %43  ;;  %v47_v12 = vpop.permute.xlu1 %46 }
  0x7e   :  { %vm48_vm2 = vcmp.eq.s32.totalorder %v44_v11, %v33_v10  ;;  %vm49_vm4 = vcmp.eq.s32.totalorder %v47_v12, %v33_v10  ;;  %v1897_v10 = vld [vmem:[%s2735_s5] ss:$0 sm:$0xff]  ;;  %s1976_s5 = smov 72  }
  0x7f   :  { %vm50_vm5 = vmor %vm40_vm1, %vm48_vm2  ;;  %vm1075_vm1 = vcmask 130048  }
  0x80   :  { %v1812_v14 = vsel %vm50_vm5, 1.0, %v1969_v13  ;;  %vm51_vm6 = vmor %vm41_vm0, %vm49_vm4  ;;  %vm934_vm0 = vcmask 64512  }
  0x81   :  { %1814 = vmatmul.msk.f32.vlgmr.msra.gmra.mxu0 %vm61_vm3, %v1812_v14  ;;  %v1813_v15 = vsel %vm51_vm6, 1.0, %v1969_v13 }
  0x82   :  { %1815 = vmatmul.msk.f32.vlgmr.msra.gmra.mxu1 %vm61_vm3, %v1813_v15 }
  0xfe   :  { %v85_v17 = vpop.f32.mrf.mxu0 }
  0xff   :  { %v86_v18 = vadd.f32 %v85_v17, %v59_v16  ;;  %v88_v20 = vpop.f32.mrf.mxu1 }
 0x100   :  { %v89_v22 = vadd.f32 %v88_v20, %v60_v19 }
 0x101   :  { %v93_v21 = vsel %vm92_vm7, %v86_v18, 0.0 }
 0x102   :  { %94 = vadd.xlane.f32.xlu2 %v93_v21  ;;  %v96_v23 = vsel %vm92_vm7, %v89_v22, 0.0 }
 0x10a   :  { %97 = vadd.xlane.f32.xlu2 %v96_v23 }
 0x175   :  { %v95_v31 = vpop.xlane.xlu2 %94 }
 0x176   :  { %v106_v32 = vmul.f32 %v2059_v30, %v95_v31 }
 0x178   :  { %v108_v33 = vsub.f32 %v86_v18, %v106_v32 }
 0x17a   :  { %v110_v34 = vmul.f32 %v108_v33, %v108_v33 }
 0x17c   :  { %v112_v35 = vsel %vm92_vm7, %v110_v34, 0.0 }
 0x17d   :  { %113 = vadd.xlane.f32.xlu1 %v112_v35  ;;  %v98_v36 = vpop.xlane.xlu2 %97 }
 0x17e   :  { %v107_v37 = vmul.f32 %v2059_v30, %v98_v36 }
 0x180   :  { %v109_v38 = vsub.f32 %v89_v22, %v107_v37  ;;  %v1978_v22 = vmov 1983009808  }
 0x181   :  { %v261_v23 = vunpack.c.l.s4 %v1978_v22 }
 0x182   :  { %v111_v39 = vmul.f32 %v109_v38, %v109_v38 }
 0x183   :  { %v2115_v29 = vunpack.c.0.s8 %v261_v23 }
 0x184   :  { %v115_v40 = vsel %vm92_vm7, %v111_v39, 0.0 }
 0x185   :  { %116 = vadd.xlane.f32.xlu2 %v115_v40 }
 0x1f0   :  { %v114_v45 = vpop.xlane.xlu1 %113 }
 0x1f1   :  { %v118_v46 = vmul.f32 %v114_v45, %v2059_v30 }
 0x1f3   :  { %v120_v47 = vadd.f32 1e-05, %v118_v46 }
 0x1f5   :  { %1900 = vrsqrt.f32 %v120_v47  ;;  %vm128_vm10 = vweird.f32 %v120_v47 }
 0x1f8   :  { %v117_v48 = vpop.xlane.xlu2 %116 }
 0x1f9   :  { %v119_v49 = vmul.f32 %v117_v48, %v2059_v30 }
 0x1fb   :  { %v1901_v50 = vpop.eup %1900  ;;  %v121_v51 = vadd.f32 1e-05, %v119_v49 }
 0x1fc   :  { %v123_v52 = vmul.f32 %v1901_v50, %v120_v47  ;;  %vm129_vm9 = vweird.f32 %v1901_v50 }
 0x1fd   :  { %1902 = vrsqrt.f32 %v121_v51  ;;  %vm130_vm11 = vmor %vm128_vm10, %vm129_vm9  ;;  %vm138_vm13 = vweird.f32 %v121_v51 }
 0x1fe   :  { %v124_v53 = vmul.f32 %v1901_v50, %v123_v52  ;;  %v2132_v52 = vunpack.c.0.s8 %v309_v42 }
 0x200   :  { %v125_v54 = vmul.f32 0.5, %v124_v53 }
 0x202   :  { %v126_v55 = vsub.f32 1.5, %v125_v54 }
 0x203   :  { %v1903_v57 = vpop.eup %1902 }
 0x204   :  { %v127_v58 = vmul.f32 %v1901_v50, %v126_v55  ;;  %v133_v59 = vmul.f32 %v1903_v57, %v121_v51  ;;  %vm139_vm12 = vweird.f32 %v1903_v57 }
 0x205   :  { %vm140_vm14 = vmor %vm138_vm13, %vm139_vm12 }
 0x206   :  { %v131_v61 = vsel %vm130_vm11, %v1901_v50, %v127_v58  ;;  %v134_v62 = vmul.f32 %v1903_v57, %v133_v59 }
 0x207   :  { %v142_v63 = vmul.f32 %v131_v61, %v108_v33 }
 0x208   :  { %v135_v1 = vmul.f32 0.5, %v134_v62 }
 0x209   :  { %v145_v2 = vmul.f32 %v144_v60, %v142_v63 }
 0x20a   :  { %v136_v3 = vsub.f32 1.5, %v135_v1 }
 0x20b   :  { %v2082_v4 = vadd.f32 %v147_v0, %v145_v2 }
 0x20c   :  { %v137_v5 = vmul.f32 %v1903_v57, %v136_v3 }
 0x20d   :  { %1816 = vmatmul.msk.f32.vlgmr.msrb.gmra.mxu1 %vm92_vm7, %v2082_v4 }
 0x20e   :  { %v141_v6 = vsel %vm140_vm14, %v1903_v57, %v137_v5 }
 0x20f   :  { %v143_v7 = vmul.f32 %v141_v6, %v109_v38 }
 0x211   :  { %v146_v8 = vmul.f32 %v144_v60, %v143_v7 }
 0x213   :  { %v2086_v9 = vadd.f32 %v147_v0, %v146_v8 }
 0x215   :  { %1817 = vmatmul.msk.f32.gmra.mxu1 %vm92_vm7, %v2086_v9 }
 0x28a   :  { %v181_v11 = vpop.f32.mrf.mxu1 }
 0x28b   :  { %v2093_v12 = vadd.f32 %v1897_v10, %v181_v11 }
 0x28d   :  { %213 = vrot.lane.b32.xlu1 %v2093_v12, %s1971_s27  ;;  %189 = vrot.lane.b32.xlu0 %v2093_v12, %s1972_s28  ;;  %v258_v28 = vrot.slane %v2093_v12, 4 }
 0x28e   :  { %201 = vrot.lane.b32.xlu2 %v2093_v12, %s1973_s29 }
 0x292   :  { %v184_v13 = vpop.f32.mrf.mxu1 }
 0x293   :  { %v2100_v14 = vadd.f32 %v1897_v10, %v184_v13 }
 0x295   :  { %207 = vrot.lane.b32.xlu0 %v2093_v12, %s1974_s30  ;;  %v426_v45 = vrot.slane %v2100_v14, 4 }
 0x296   :  { %195 = vrot.lane.b32.xlu2 %v2093_v12, %s1975_s9 }
 0x29d   :  { %191 = vrot.lane.b32.xlu0 %v2100_v14, %s1972_s28 }
 0x29e   :  { %203 = vrot.lane.b32.xlu2 %v2100_v14, %s1973_s29 }
 0x2a5   :  { %215 = vrot.lane.b32.xlu0 %v2100_v14, %s1971_s27 }
 0x2a6   :  { %209 = vrot.lane.b32.xlu2 %v2100_v14, %s1974_s30 }
 0x2ad   :  { %197 = vrot.lane.b32.xlu0 %v2100_v14, %s1975_s9 }
 0x2ae   :  { %225 = vrot.lane.b32.xlu2 %v2093_v12, %s1976_s5 }
 0x2b5   :  { %227 = vrot.lane.b32.xlu0 %v2100_v14, %s1976_s5 }
 0x2bd   :  { %221 = vrot.lane.b32.xlu0 %v2100_v14, %s1977_s10 }
 0x2c5   :  { %219 = vrot.lane.b32.xlu0 %v2093_v12, %s1977_s10 }
 0x2e8   :  { %v202_v15 = vpop.permute.xlu2 %201 }
 0x2e9   :  { %v268_v24 = vrot.slane %v202_v15, 4 }
 0x2f0   :  { %v196_v18 = vpop.permute.xlu2 %195 }
 0x2f1   :  { %v255_v25 = vrot.slane %v196_v18, 4  ;;  %v259_v33 = vsel %vm256_vm15, %v196_v18, %v258_v28 }
 0x2f2   :  { %v267_v40 = vperm.slane %v259_v33, %v2115_v29 }
 0x2f3   :  { %v257_v32 = vsel %vm256_vm15, %v255_v25, %v2093_v12 }
 0x2f4   :  { %v263_v37 = vperm.slane %v257_v32, %v2115_v29  ;;  %v318_v51 = vrot.slane %v267_v40, 4 }
 0x2f6   :  { %v306_v47 = vrot.slane %v263_v37, 4 }
 0x2f8   :  { %v204_v20 = vpop.permute.xlu2 %203 }
 0x2f9   :  { %v436_v46 = vrot.slane %v204_v20, 4 }
 0x2ff   :  { %v190_v16 = vpop.permute.xlu0 %189  ;;  %v214_v58 = vpop.permute.xlu1 %213 }
 0x300   :  { %v269_v26 = vsel %vm256_vm15, %v268_v24, %v190_v16  ;;  %v270_v27 = vrot.slane %v190_v16, 4  ;;  %v2117_v31 = vpop.permute.xlu2 %209  ;;  %v294_v6 = vrot.slane %v214_v58, 4 }
 0x301   :  { %v275_v34 = vperm.slane %v269_v26, %v2115_v29  ;;  %v450_v18 = vrot.slane %v2117_v31, 4 }
 0x302   :  { %v271_v35 = vsel %vm256_vm15, %v202_v15, %v270_v27 }
 0x303   :  { %v279_v43 = vperm.slane %v271_v35, %v2115_v29  ;;  %v304_v44 = vrot.slane %v275_v34, 4  ;;  %v307_v55 = vsel %vm256_vm15, %v275_v34, %v306_v47 }
 0x304   :  { %v2143_v3 = vperm.slane %v307_v55, %v2132_v52 }
 0x305   :  { %v305_v54 = vsel %vm256_vm15, %v304_v44, %v263_v37  ;;  %v316_v56 = vrot.slane %v279_v43, 4  ;;  %v319_v59 = vsel %vm256_vm15, %v279_v43, %v318_v51 }
 0x306   :  { %v2146_v7 = vperm.slane %v305_v54, %v2132_v52  ;;  %v2149_v8 = vperm.slane %v319_v59, %v2132_v52  ;;  %v358_v23 = vrot.slane %v2143_v3, 4 }
 0x307   :  { %v2111_v17 = vpop.permute.xlu0 %207  ;;  %v317_v11 = vsel %vm256_vm15, %v316_v56, %v267_v40 }
 0x308   :  { %v226_v57 = vpop.permute.xlu2 %225  ;;  %v2161_v27 = vperm.slane %v317_v11, %v2132_v52  ;;  %v354_v28 = vrot.slane %v2146_v7, 4  ;;  %v366_v32 = vrot.slane %v2149_v8, 4  ;;  %v282_v42 = vrot.slane %v2111_v17, 4 }
 0x309   :  { %v292_v5 = vrot.slane %v226_v57, 4 }
 0x30b   :  { %v293_v24 = vsel %vm256_vm15, %v292_v5, %v214_v58 }
 0x30f   :  { %v192_v19 = vpop.permute.xlu0 %191 }
 0x310   :  { %v438_v38 = vrot.slane %v192_v19, 4  ;;  %v437_v53 = vsel %vm256_vm15, %v436_v46, %v192_v19  ;;  %v295_v19 = vsel %vm256_vm15, %v226_v57, %v294_v6  ;;  %v362_v46 = vrot.slane %v2161_v27, 4 }
 0x311   :  { %v443_v0 = vperm.slane %v437_v53, %v2115_v29  ;;  %v2167_v34 = vperm.slane %v295_v19, %v2115_v29 }
 0x312   :  { %v439_v48 = vsel %vm256_vm15, %v204_v20, %v438_v38  ;;  %v2173_v38 = vperm.slane %v293_v24, %v2115_v29 }
 0x313   :  { %v447_v60 = vperm.slane %v439_v48, %v2115_v29  ;;  %v472_v20 = vrot.slane %v443_v0, 4  ;;  %v340_v56 = vrot.slane %v2167_v34, 4 }
 0x314   :  { %v328_v55 = vrot.slane %v2173_v38, 4 }
 0x315   :  { %v484_v13 = vrot.slane %v447_v60, 4 }
 0x317   :  { %v216_v21 = vpop.permute.xlu0 %215 }
 0x318   :  { %v462_v1 = vrot.slane %v216_v21, 4 }
 0x31f   :  { %v198_v36 = vpop.permute.xlu0 %197 }
 0x320   :  { %v424_v39 = vrot.slane %v198_v36, 4  ;;  %v427_v50 = vsel %vm256_vm15, %v198_v36, %v426_v45 }
 0x321   :  { %v435_v62 = vperm.slane %v427_v50, %v2115_v29 }
 0x322   :  { %v425_v49 = vsel %vm256_vm15, %v424_v39, %v2100_v14 }
 0x323   :  { %v431_v61 = vperm.slane %v425_v49, %v2115_v29  ;;  %v486_v16 = vrot.slane %v435_v62, 4  ;;  %v485_v25 = vsel %vm256_vm15, %v484_v13, %v435_v62 }
 0x324   :  { %v491_v39 = vperm.slane %v485_v25, %v2132_v52 }
 0x325   :  { %v474_v15 = vrot.slane %v431_v61, 4  ;;  %v473_v33 = vsel %vm256_vm15, %v472_v20, %v431_v61  ;;  %v487_v35 = vsel %vm256_vm15, %v447_v60, %v486_v16 }
 0x326   :  { %v479_v43 = vperm.slane %v473_v33, %v2132_v52  ;;  %v495_v48 = vperm.slane %v487_v35, %v2132_v52  ;;  %v530_v57 = vrot.slane %v491_v39, 4 }
 0x327   :  { %v228_v63 = vpop.permute.xlu0 %227 }
 0x328   :  { %v460_v2 = vrot.slane %v228_v63, 4  ;;  %v463_v10 = vsel %vm256_vm15, %v228_v63, %v462_v1  ;;  %v522_v59 = vrot.slane %v479_v43, 4  ;;  %v534_v5 = vrot.slane %v495_v48, 4 }
 0x329   :  { %v471_v26 = vperm.slane %v463_v10, %v2115_v29 }
 0x32a   :  { %v461_v22 = vsel %vm256_vm15, %v460_v2, %v216_v21  ;;  %v475_v21 = vsel %vm256_vm15, %v443_v0, %v474_v15 }
 0x32b   :  { %v467_v36 = vperm.slane %v461_v22, %v2115_v29  ;;  %v508_v44 = vrot.slane %v471_v26, 4  ;;  %v483_v47 = vperm.slane %v475_v21, %v2132_v52 }
 0x32d   :  { %v496_v50 = vrot.slane %v467_v36, 4  ;;  %v526_v2 = vrot.slane %v483_v47, 4 }
 0x32f   :  { %v222_v37 = vpop.permute.xlu0 %221 }
 0x330   :  { %v448_v40 = vrot.slane %v222_v37, 4  ;;  %v451_v41 = vsel %vm256_vm15, %v222_v37, %v450_v18 }
 0x331   :  { %v459_v45 = vperm.slane %v451_v41, %v2115_v29 }
 0x332   :  { %v449_v49 = vsel %vm256_vm15, %v448_v40, %v2117_v31 }
 0x333   :  { %v455_v51 = vperm.slane %v449_v49, %v2115_v29  ;;  %v509_v53 = vsel %vm256_vm15, %v508_v44, %v459_v45  ;;  %v510_v54 = vrot.slane %v459_v45, 4 }
 0x334   :  { %v515_v58 = vperm.slane %v509_v53, %v2132_v52 }
 0x335   :  { %v497_v60 = vsel %vm256_vm15, %v496_v50, %v455_v51  ;;  %v498_v61 = vrot.slane %v455_v51, 4  ;;  %v511_v62 = vsel %vm256_vm15, %v471_v26, %v510_v54 }
 0x336   :  { %v503_v31 = vperm.slane %v497_v60, %v2132_v52  ;;  %v519_v63 = vperm.slane %v511_v62, %v2132_v52  ;;  %v528_v0 = vrot.slane %v515_v58, 4  ;;  %v531_v1 = vsel %vm256_vm15, %v515_v58, %v530_v57 }
 0x337   :  { %v499_v6 = vsel %vm256_vm15, %v467_v36, %v498_v61  ;;  %v742_v10 = vrot.slane %v531_v1, 4  ;;  %v220_v11 = vpop.permute.xlu0 %219 }
 0x338   :  { %v507_v13 = vperm.slane %v499_v6, %v2132_v52  ;;  %v520_v15 = vrot.slane %v503_v31, 4  ;;  %v2198_v16 = vsel %vm256_vm15, %v503_v31, %v522_v59  ;;  %v2201_v18 = vsel %vm256_vm15, %v528_v0, %v491_v39 }
 0x339   :  { %v532_v19 = vrot.slane %v519_v63, 4  ;;  %v535_v20 = vsel %vm256_vm15, %v519_v63, %v534_v5  ;;  %v730_v22 = vrot.slane %v2201_v18, 4  ;;  %v280_v24 = vrot.slane %v220_v11, 4 }
 0x33a   :  { %v524_v25 = vrot.slane %v507_v13, 4  ;;  %v740_v26 = vrot.slane %v535_v20, 4  ;;  %v283_v33 = vsel %vm256_vm15, %v220_v11, %v282_v42  ;;  %v2207_v21 = vsel %vm256_vm15, %v520_v15, %v479_v43 }
 0x33b   :  { %v281_v35 = vsel %vm256_vm15, %v280_v24, %v2111_v17  ;;  %v291_v36 = vperm.slane %v283_v33, %v2115_v29  ;;  %v2213_v37 = vsel %vm256_vm15, %v507_v13, %v526_v2  ;;  %v2216_v39 = vsel %vm256_vm15, %v532_v19, %v495_v48 }
 0x33c   :  { %v741_v40 = vsel %vm256_vm15, %v740_v26, %v531_v1  ;;  %v287_v41 = vperm.slane %v281_v35, %v2115_v29  ;;  %v2221_v42 = vsel %vm256_vm15, %v524_v25, %v483_v47  ;;  %v706_v43 = vrot.slane %v2207_v21, 4 }
 0x33d   :  { %v2225_v44 = vperm.slane %v741_v40, %v2115_v29  ;;  %v341_v17 = vsel %vm256_vm15, %v340_v56, %v291_v36  ;;  %v342_v45 = vrot.slane %v291_v36, 4  ;;  %v704_v49 = vrot.slane %v2221_v42, 4 }
 0x33e   :  { %v329_v48 = vsel %vm256_vm15, %v328_v55, %v287_v41  ;;  %v330_v50 = vrot.slane %v287_v41, 4  ;;  %v347_v51 = vperm.slane %v341_v17, %v2132_v52  ;;  %v707_v53 = vsel %vm256_vm15, %v2221_v42, %v706_v43 }
 0x33f   :  { %v335_v47 = vperm.slane %v329_v48, %v2132_v52  ;;  %v343_v54 = vsel %vm256_vm15, %v2167_v34, %v342_v45  ;;  %v715_v57 = vperm.slane %v707_v53, %v2115_v29  ;;  %v716_v56 = vrot.slane %v2213_v37, 4 }
 0x340   :  { %v331_v58 = vsel %vm256_vm15, %v2173_v38, %v330_v50  ;;  %v351_v55 = vperm.slane %v343_v54, %v2132_v52  ;;  %v360_v59 = vrot.slane %v347_v51, 4  ;;  %v363_v60 = vsel %vm256_vm15, %v347_v51, %v362_v46 }
 0x341   :  { %v339_v61 = vperm.slane %v331_v58, %v2132_v52  ;;  %v352_v62 = vrot.slane %v335_v47, 4  ;;  %v2246_v31 = vsel %vm256_vm15, %v335_v47, %v354_v28  ;;  %v630_v34 = vrot.slane %v363_v60, 4 }
 0x342   :  { %v361_v63 = vsel %vm256_vm15, %v360_v59, %v2161_v27  ;;  %v364_v0 = vrot.slane %v351_v55, 4  ;;  %v367_v38 = vsel %vm256_vm15, %v351_v55, %v366_v32  ;;  %v606_v1 = vrot.slane %v2246_v31, 4 }
 0x343   :  { %v356_v46 = vrot.slane %v339_v61, 4  ;;  %v618_v2 = vrot.slane %v361_v63, 4  ;;  %v628_v5 = vrot.slane %v367_v38, 4  ;;  %v718_v6 = vrot.slane %v2198_v16, 4 }
 0x344   :  { %v365_v28 = vsel %vm256_vm15, %v364_v0, %v2149_v8  ;;  %v728_v11 = vrot.slane %v2216_v39, 4  ;;  %v731_v27 = vsel %vm256_vm15, %v2216_v39, %v730_v22  ;;  %v743_v13 = vsel %vm256_vm15, %v535_v20, %v742_v10 }
 0x345   :  { %v616_v15 = vrot.slane %v365_v28, 4  ;;  %v629_v32 = vsel %vm256_vm15, %v628_v5, %v363_v60  ;;  %v719_v19 = vsel %vm256_vm15, %v2213_v37, %v718_v6  ;;  %v739_v24 = vperm.slane %v731_v27, %v2115_v29 }
 0x346   :  { %v2266_v25 = vperm.slane %v629_v32, %v2115_v29  ;;  %v727_v8 = vperm.slane %v719_v19, %v2115_v29  ;;  %v751_v26 = vperm.slane %v743_v13, %v2115_v29  ;;  %v766_v33 = vrot.slane %v715_v57, 4 }
 0x347   :  { %v617_v22 = vsel %vm256_vm15, %v616_v15, %v361_v63  ;;  %v790_v10 = vrot.slane %v739_v24, 4  ;;  %v353_v20 = vsel %vm256_vm15, %v352_v62, %v2146_v7  ;;  %v357_v35 = vsel %vm256_vm15, %v356_v46, %v2143_v3 }
 0x348   :  { %v764_v36 = vrot.slane %v727_v8, 4  ;;  %v788_v40 = vrot.slane %v751_v26, 4  ;;  %v767_v41 = vsel %vm256_vm15, %v727_v8, %v766_v33  ;;  %v359_v43 = vsel %vm256_vm15, %v339_v61, %v358_v23 }
 0x349   :  { %v775_v17 = vperm.slane %v767_v41, %v2132_v52  ;;  %v791_v45 = vsel %vm256_vm15, %v751_v26, %v790_v10  ;;  %v592_v48 = vrot.slane %v357_v35, 4  ;;  %v594_v50 = vrot.slane %v353_v20, 4 }
 0x34a   :  { %v765_v51 = vsel %vm256_vm15, %v764_v36, %v715_v57  ;;  %v789_v7 = vsel %vm256_vm15, %v788_v40, %v739_v24  ;;  %v799_v53 = vperm.slane %v791_v45, %v2132_v52  ;;  %v604_v47 = vrot.slane %v359_v43, 4 }
 0x34b   :  { %v771_v54 = vperm.slane %v765_v51, %v2132_v52  ;;  %v795_v58 = vperm.slane %v789_v7, %v2132_v52  ;;  %v814_v3 = vrot.slane %v775_v17, 4  ;;  %v595_v23 = vsel %vm256_vm15, %v357_v35, %v594_v50 }
 0x34c   :  { %v812_v55 = vrot.slane %v799_v53, 4  ;;  %v603_v59 = vperm.slane %v595_v23, %v2115_v29  ;;  %v607_v60 = vsel %vm256_vm15, %v359_v43, %v606_v1  ;;  %v619_v61 = vsel %vm256_vm15, %v365_v28, %v618_v2 }
 0x34d   :  { %v808_v57 = vrot.slane %v795_v58, 4  ;;  %v810_v62 = vrot.slane %v771_v54, 4  ;;  %v815_v63 = vsel %vm256_vm15, %v799_v53, %v814_v3  ;;  %v615_v0 = vperm.slane %v607_v60, %v2115_v29 }
 0x34e   :  { %v813_v46 = vsel %vm256_vm15, %v812_v55, %v775_v17  ;;  %1830 = vmatpush.xpose.msk.msra.mxu1 %vm934_vm0, %v815_v63  ;;  %v627_v5 = vperm.slane %v619_v61, %v2115_v29  ;;  %v631_v6 = vsel %vm256_vm15, %v367_v38, %v630_v34  ;;  %v654_v27 = vrot.slane %v603_v59, 4 }
 0x34f   :  { %v809_v13 = vsel %vm256_vm15, %v808_v57, %v771_v54  ;;  %v811_v1 = vsel %vm256_vm15, %v795_v58, %v810_v62  ;;  %1826 = vmatpush.xpose.msk.msrb.mxu0 %vm934_vm0, %v813_v46  ;;  %v639_v2 = vperm.slane %v631_v6, %v2115_v29  ;;  %v652_v28 = vrot.slane %v615_v0, 4 }
 0x350   :  { %1818 = vmatpush.xpose.msk.msra.mxu2 %vm934_vm0, %v809_v13  ;;  %1822 = vmatpush.xpose.msk.msra.mxu3 %vm934_vm0, %v811_v1  ;;  %v655_v15 = vsel %vm256_vm15, %v615_v0, %v654_v27  ;;  %v678_v32 = vrot.slane %v627_v5, 4  ;;  %v593_v19 = vsel %vm256_vm15, %v592_v48, %v353_v20  ;;  %v605_v34 = vsel %vm256_vm15, %v604_v47, %v2246_v31 }
 0x351   :  { %v653_v38 = vsel %vm256_vm15, %v652_v28, %v603_v59  ;;  %v676_v24 = vrot.slane %v639_v2, 4  ;;  %v663_v8 = vperm.slane %v655_v15, %v2132_v52  ;;  %v599_v26 = vperm.slane %v593_v19, %v2115_v29 }
 0x352   :  { %v659_v33 = vperm.slane %v653_v38, %v2132_v52  ;;  %v679_v10 = vsel %vm256_vm15, %v639_v2, %v678_v32  ;;  %v611_v35 = vperm.slane %v605_v34, %v2115_v29  ;;  %v623_v36 = vperm.slane %v617_v22, %v2115_v29 }
 0x353   :  { %v677_v20 = vsel %vm256_vm15, %v676_v24, %v627_v5  ;;  %v687_v40 = vperm.slane %v679_v10, %v2132_v52  ;;  %v642_v31 = vrot.slane %v599_v26, 4  ;;  %v664_v41 = vrot.slane %v2266_v25, 4 }
 0x354   :  { %v683_v43 = vperm.slane %v677_v20, %v2132_v52  ;;  %v698_v17 = vrot.slane %v659_v33, 4  ;;  %v640_v45 = vrot.slane %v611_v35, 4  ;;  %v666_v48 = vrot.slane %v623_v36, 4 }
 0x355   :  { %v700_v50 = vrot.slane %v687_v40, 4  ;;  %v665_v51 = vsel %vm256_vm15, %v664_v41, %v623_v36  ;;  %v702_v7 = vrot.slane %v663_v8, 4  ;;  %v643_v53 = vsel %vm256_vm15, %v611_v35, %v642_v31 }
 0x356   :  { %v696_v47 = vrot.slane %v683_v43, 4  ;;  %v699_v22 = vsel %vm256_vm15, %v683_v43, %v698_v17  ;;  %v641_v54 = vsel %vm256_vm15, %v640_v45, %v599_v26  ;;  %v671_v58 = vperm.slane %v665_v51, %v2132_v52 }
 0x357   :  { %1823 = vmatpush.xpose.msk.msra.mxu3 %vm934_vm0, %v699_v22  ;;  %v701_v3 = vsel %vm256_vm15, %v700_v50, %v663_v8  ;;  %v647_v23 = vperm.slane %v641_v54, %v2132_v52  ;;  %v703_v55 = vsel %vm256_vm15, %v687_v40, %v702_v7  ;;  %v651_v59 = vperm.slane %v643_v53, %v2132_v52  ;;  %v932_v50 = vld [vmem:[%s2733_s3] sm:$0xff] }
 0x358   :  { %v697_v60 = vsel %vm256_vm15, %v696_v47, %v659_v33  ;;  %1827 = vmatpush.xpose.msk.msrb.mxu0 %vm934_vm0, %v701_v3  ;;  %v688_v61 = vrot.slane %v671_v58, 4  ;;  %1831 = vmatpush.xpose.msk.msra.mxu1 %vm934_vm0, %v703_v55  ;;  %v667_v57 = vsel %vm256_vm15, %v2266_v25, %v666_v48  ;;  %v705_v62 = vsel %vm256_vm15, %v704_v49, %v2207_v21 }
 0x359   :  { %1819 = vmatpush.xpose.msk.msra.mxu2 %vm934_vm0, %v697_v60  ;;  %v690_v63 = vrot.slane %v647_v23, 4  ;;  %v675_v0 = vperm.slane %v667_v57, %v2132_v52  ;;  %v694_v46 = vrot.slane %v651_v59, 4  ;;  %v711_v5 = vperm.slane %v705_v62, %v2115_v29 }
 0x35a   :  { %v689_v6 = vsel %vm256_vm15, %v688_v61, %v647_v23  ;;  %v717_v25 = vsel %vm256_vm15, %v716_v56, %v2198_v16  ;;  %v729_v21 = vsel %vm256_vm15, %v728_v11, %v2201_v18  ;;  %v776_v42 = vrot.slane %v2225_v44, 4 }
 0x35b   :  { %v924_v49 = vmul.f32 0.35355338, %v689_v6  ;;  %v691_v27 = vsel %vm256_vm15, %v671_v58, %v690_v63  ;;  %v692_v13 = vrot.slane %v675_v0, 4  ;;  %v695_v1 = vsel %vm256_vm15, %v675_v0, %v694_v46 }
 0x35c   :  { %v926_v2 = vmul.f32 0.35355338, %v691_v27  ;;  %v930_v28 = vmul.f32 0.35355338, %v695_v1  ;;  %v723_v15 = vperm.slane %v717_v25, %v2115_v29  ;;  %v735_v37 = vperm.slane %v729_v21, %v2115_v29 }
 0x35d   :  { %1820 = vmatmul.msk.f32.vlgmr.msra.gmra.mxu2 %vm934_vm0, %v924_v49  ;;  %v693_v16 = vsel %vm256_vm15, %v692_v13, %v651_v59  ;;  %v754_v39 = vrot.slane %v711_v5, 4  ;;  %v933_v59 = vld [vmem:[%s2733_s3 + $0x8] sm:$0xff]  ;;  %v1882_v13 = vpack.i.bf16 %v2093_v12, %v2100_v14  ;;  %s1980_s3 = smov 56  }
 0x35e   :  { %1824 = vmatmul.msk.f32.vlgmr.msra.gmra.mxu3 %vm934_vm0, %v926_v2  ;;  %v928_v18 = vmul.f32 0.35355338, %v693_v16  ;;  %1832 = vmatmul.msk.f32.vlgmr.msra.gmra.mxu1 %vm934_vm0, %v930_v28  ;;  %v752_v56 = vrot.slane %v723_v15, 4  ;;  %v777_v11 = vsel %vm256_vm15, %v776_v42, %v735_v37  ;;  %v778_v32 = vrot.slane %v735_v37, 4 }
 0x35f   :  { %v783_v19 = vperm.slane %v777_v11, %v2132_v52  ;;  %v755_v34 = vsel %vm256_vm15, %v723_v15, %v754_v39 }
 0x360   :  { %1828 = vmatmul.msk.f32.vlgmr.msrb.gmra.mxu0 %vm934_vm0, %v928_v18  ;;  %v753_v38 = vsel %vm256_vm15, %v752_v56, %v711_v5  ;;  %v763_v24 = vperm.slane %v755_v34, %v2132_v52  ;;  %v779_v8 = vsel %vm256_vm15, %v2225_v44, %v778_v32 }
 0x361   :  { %v759_v26 = vperm.slane %v753_v38, %v2132_v52  ;;  %v800_v33 = vrot.slane %v783_v19, 4  ;;  %v787_v10 = vperm.slane %v779_v8, %v2132_v52 }
 0x362   :  { %v806_v35 = vrot.slane %v763_v24, 4 }
 0x363   :  { %v801_v36 = vsel %vm256_vm15, %v800_v33, %v759_v26  ;;  %v802_v20 = vrot.slane %v759_v26, 4  ;;  %v804_v40 = vrot.slane %v787_v10, 4 }
 0x364   :  { %v925_v31 = vmul.f32 0.35355338, %v801_v36  ;;  %v807_v41 = vsel %vm256_vm15, %v787_v10, %v806_v35 }
 0x365   :  { %v803_v43 = vsel %vm256_vm15, %v783_v19, %v802_v20  ;;  %v805_v17 = vsel %vm256_vm15, %v804_v40, %v763_v24  ;;  %v931_v45 = vmul.f32 0.35355338, %v807_v41 }
 0x366   :  { %1821 = vmatmul.msk.f32.gmra.mxu2 %vm934_vm0, %v925_v31  ;;  %v927_v44 = vmul.f32 0.35355338, %v803_v43  ;;  %v929_v48 = vmul.f32 0.35355338, %v805_v17 }
 0x367   :  { %1833 = vmatmul.msk.f32.gmra.mxu1 %vm934_vm0, %v931_v45 }
 0x368   :  { %1825 = vmatmul.msk.f32.gmra.mxu3 %vm934_vm0, %v927_v44  ;;  %1829 = vmatmul.msk.f32.gmra.mxu0 %vm934_vm0, %v929_v48 }
 0x3db   :  { %v1069_v51 = vpop.f32.mrf.mxu1 }
 0x3dc   :  { %v1070_v7 = vadd.f32 %v1069_v51, %v932_v50 }
 0x3dd   :  { %v1034_v53 = vpop.f32.mrf.mxu0 }
 0x3de   :  { %v1035_v47 = vadd.f32 %v1034_v53, %v932_v50  ;;  %v1094_v22 = vsel %vm1075_vm1, %v1070_v7, -inf }
 0x3df   :  { %1095 = vmax.xlane.f32.xlu2 %v1094_v22 }
 0x3e0   :  { %v1088_v54 = vsel %vm1075_vm1, %v1035_v47, -inf  ;;  %v964_v58 = vpop.f32.mrf.mxu2 }
 0x3e1   :  { %1089 = vmax.xlane.f32.xlu0 %v1088_v54  ;;  %v999_v3 = vpop.f32.mrf.mxu3  ;;  %v965_v23 = vadd.f32 %v964_v58, %v932_v50 }
 0x3e2   :  { %v1000_v55 = vadd.f32 %v999_v3, %v932_v50 }
 0x3e3   :  { %v1076_v63 = vsel %vm1075_vm1, %v965_v23, -inf }
 0x3e4   :  { %v1082_v60 = vsel %vm1075_vm1, %v1000_v55, -inf  ;;  %v1072_v57 = vpop.f32.mrf.mxu1 }
 0x3e5   :  { %v1037_v61 = vpop.f32.mrf.mxu0  ;;  %1083 = vmax.xlane.f32.xlu1 %v1082_v60  ;;  %v2385_v0 = vadd.f32 %v1072_v57, %v933_v59 }
 0x3e6   :  { %v1038_v62 = vadd.f32 %v1037_v61, %v933_v59 }
 0x3e7   :  { %1077 = vmax.xlane.f32.xlu2 %v1076_v63  ;;  %v1097_v25 = vsel %vm1075_vm1, %v2385_v0, -inf }
 0x3e8   :  { %v1091_v46 = vsel %vm1075_vm1, %v1038_v62, -inf }
 0x3e9   :  { %1092 = vmax.xlane.f32.xlu0 %v1091_v46  ;;  %v967_v21 = vpop.f32.mrf.mxu2 }
 0x3ea   :  { %v968_v49 = vadd.f32 %v967_v21, %v933_v59 }
 0x3eb   :  { %v1002_v5 = vpop.f32.mrf.mxu3 }
 0x3ec   :  { %v1003_v6 = vadd.f32 %v1002_v5, %v933_v59  ;;  %v1079_v27 = vsel %vm1075_vm1, %v968_v49, -inf }
 0x3ed   :  { %1098 = vmax.xlane.f32.xlu1 %v1097_v25 }
 0x3ee   :  { %v1085_v42 = vsel %vm1075_vm1, %v1003_v6, -inf }
 0x3ef   :  { %1086 = vmax.xlane.f32.xlu2 %v1085_v42 }
 0x3f5   :  { %1080 = vmax.xlane.f32.xlu1 %v1079_v27 }
 0x3fd   :  { %1883 = vrot.lane.b32.xlu0 %v1882_v13, %s1980_s3 }
 0x405   :  { %1893 = vrot.lane.b32.xlu0 %v1882_v13, %s1981_s2 }
 0x407   :  { %1878 = vrot.lane.b32.xlu2 %v1882_v13, %s1982_s14 }
 0x40e   :  { %1888 = vrot.lane.b32.xlu1 %v1882_v13, %s1983_s15 }
 0x452   :  { %v1096_v1 = vpop.xlane.xlu2 %1095 }
 0x453   :  { %v1106_v11 = vsub.f32 %v1070_v7, %v1096_v1 }
 0x454   :  { %v1090_v2 = vpop.xlane.xlu0 %1089 }
 0x455   :  { %v1104_v28 = vsub.f32 %v1035_v47, %v1090_v2  ;;  %v1120_v34 = vmul.f32 1.442695, %v1106_v11 }
 0x457   :  { %v1116_v15 = vmul.f32 1.442695, %v1104_v28 }
 0x458   :  { %v1084_v37 = vpop.xlane.xlu1 %1083 }
 0x459   :  { %1904 = vpow2.f32 %v1116_v15  ;;  %v1102_v16 = vsub.f32 %v1000_v55, %v1084_v37 }
 0x45a   :  { %v1078_v39 = vpop.xlane.xlu2 %1077 }
 0x45b   :  { %v1112_v18 = vmul.f32 1.442695, %v1102_v16  ;;  %v1100_v56 = vsub.f32 %v965_v23, %v1078_v39 }
 0x45c   :  { %v1093_v38 = vpop.xlane.xlu0 %1092 }
 0x45d   :  { %1906 = vpow2.f32 %v1112_v18  ;;  %v1108_v12 = vmul.f32 1.442695, %v1100_v56  ;;  %v1105_v33 = vsub.f32 %v1038_v62, %v1093_v38 }
 0x45f   :  { %v2394_v14 = vpop.eup %1904  ;;  %1908 = vpow2.f32 %v1108_v12  ;;  %v1118_v40 = vmul.f32 1.442695, %v1105_v33 }
 0x460   :  { %v1136_v32 = vsel %vm1075_vm1, %v2394_v14, 0.0  ;;  %v1099_v19 = vpop.xlane.xlu1 %1098  ;;  %1910 = vpow2.f32 %v1120_v34 }
 0x461   :  { %1137 = vadd.xlane.f32.xlu1 %v1136_v32  ;;  %v1107_v17 = vsub.f32 %v2385_v0, %v1099_v19 }
 0x462   :  { %v1087_v24 = vpop.xlane.xlu2 %1086 }
 0x463   :  { %v2398_v8 = vpop.eup %1906  ;;  %v1103_v26 = vsub.f32 %v1003_v6, %v1087_v24  ;;  %v1122_v51 = vmul.f32 1.442695, %v1107_v17 }
 0x464   :  { %v1130_v10 = vsel %vm1075_vm1, %v2398_v8, 0.0 }
 0x465   :  { %v2402_v35 = vpop.eup %1908  ;;  %v1114_v36 = vmul.f32 1.442695, %v1103_v26  ;;  %1131 = vadd.xlane.f32.xlu0 %v1130_v10 }
 0x466   :  { %v1124_v20 = vsel %vm1075_vm1, %v2402_v35, 0.0  ;;  %v2406_v43 = vpop.eup %1910 }
 0x467   :  { %1912 = vpow2.f32 %v1114_v36  ;;  %1125 = vadd.xlane.f32.xlu2 %v1124_v20  ;;  %v1142_v48 = vsel %vm1075_vm1, %v2406_v43, 0.0 }
 0x468   :  { %v1081_v31 = vpop.xlane.xlu1 %1080  ;;  %1914 = vpow2.f32 %v1118_v40 }
 0x469   :  { %v1101_v41 = vsub.f32 %v968_v49, %v1081_v31 }
 0x46a   :  { %v1879_v61 = vpop.permute.xlu2 %1878 }
 0x46b   :  { %v1110_v45 = vmul.f32 1.442695, %v1101_v41  ;;  %v1881_v46 = vunpack.i.h.bf16 %v1879_v61  ;;  %v1880_v5 = vunpack.i.l.bf16 %v1879_v61 }
 0x46d   :  { %v2409_v44 = vpop.eup %1912  ;;  %1916 = vpow2.f32 %v1110_v45  ;;  %v370_v27 = vrot.slane %v1881_v46, 4  ;;  %v538_v13 = vrot.slane %v1880_v5, 4 }
 0x46e   :  { %v1133_v50 = vsel %vm1075_vm1, %v2409_v44, 0.0  ;;  %v2415_v53 = vpop.eup %1914  ;;  %1918 = vpow2.f32 %v1122_v51 }
 0x46f   :  { %v1884_v7 = vpop.permute.xlu0 %1883  ;;  %1143 = vadd.xlane.f32.xlu2 %v1142_v48  ;;  %1134 = vadd.xlane.f32.xlu1 %v1133_v50  ;;  %v1139_v54 = vsel %vm1075_vm1, %v2415_v53, 0.0 }
 0x470   :  { %v1886_v58 = vunpack.i.h.bf16 %v1884_v7  ;;  %v1885_v3 = vunpack.i.l.bf16 %v1884_v7 }
 0x472   :  { %v382_v63 = vrot.slane %v1886_v58, 4  ;;  %v550_v0 = vrot.slane %v1885_v3, 4 }
 0x473   :  { %v2417_v47 = vpop.eup %1916 }
 0x474   :  { %v1127_v22 = vsel %vm1075_vm1, %v2417_v47, 0.0  ;;  %v2423_v60 = vpop.eup %1918 }
 0x475   :  { %1128 = vadd.xlane.f32.xlu0 %v1127_v22  ;;  %v1145_v6 = vsel %vm1075_vm1, %v2423_v60, 0.0 }
 0x477   :  { %v1894_v23 = vpop.permute.xlu0 %1893  ;;  %1140 = vadd.xlane.f32.xlu2 %v1139_v54 }
 0x478   :  { %v1896_v55 = vunpack.i.h.bf16 %v1894_v23  ;;  %v1895_v59 = vunpack.i.l.bf16 %v1894_v23 }
 0x47a   :  { %v380_v57 = vrot.slane %v1896_v55, 4  ;;  %v548_v62 = vrot.slane %v1895_v59, 4  ;;  %v383_v25 = vsel %vm256_vm15, %v1896_v55, %v382_v63  ;;  %v551_v21 = vsel %vm256_vm15, %v1895_v59, %v550_v0 }
 0x47b   :  { %v391_v1 = vperm.slane %v383_v25, %v2115_v29  ;;  %v559_v2 = vperm.slane %v551_v21, %v2115_v29 }
 0x47c   :  { %v381_v42 = vsel %vm256_vm15, %v380_v57, %v1886_v58  ;;  %v549_v49 = vsel %vm256_vm15, %v548_v62, %v1885_v3 }
 0x47d   :  { %1146 = vadd.xlane.f32.xlu0 %v1145_v6  ;;  %v387_v15 = vperm.slane %v381_v42, %v2115_v29  ;;  %v555_v37 = vperm.slane %v549_v49, %v2115_v29  ;;  %v404_v32 = vrot.slane %v391_v1, 4  ;;  %v572_v19 = vrot.slane %v559_v2, 4 }
 0x47f   :  { %v392_v24 = vrot.slane %v387_v15, 4  ;;  %v560_v26 = vrot.slane %v555_v37, 4 }
 0x480   :  { %v1889_v28 = vpop.permute.xlu1 %1888 }
 0x481   :  { %v1891_v16 = vunpack.i.h.bf16 %v1889_v28  ;;  %v1890_v39 = vunpack.i.l.bf16 %v1889_v28 }
 0x483   :  { %v368_v18 = vrot.slane %v1891_v16, 4  ;;  %v371_v56 = vsel %vm256_vm15, %v1891_v16, %v370_v27  ;;  %v536_v11 = vrot.slane %v1890_v39, 4  ;;  %v539_v12 = vsel %vm256_vm15, %v1890_v39, %v538_v13 }
 0x484   :  { %v379_v34 = vperm.slane %v371_v56, %v2115_v29  ;;  %v547_v38 = vperm.slane %v539_v12, %v2115_v29 }
 0x485   :  { %v369_v33 = vsel %vm256_vm15, %v368_v18, %v1881_v46  ;;  %v537_v10 = vsel %vm256_vm15, %v536_v11, %v1880_v5 }
 0x486   :  { %v375_v36 = vperm.slane %v369_v33, %v2115_v29  ;;  %v405_v20 = vsel %vm256_vm15, %v404_v32, %v379_v34  ;;  %v406_v40 = vrot.slane %v379_v34, 4  ;;  %v543_v31 = vperm.slane %v537_v10, %v2115_v29 }
 0x487   :  { %v411_v41 = vperm.slane %v405_v20, %v2132_v52  ;;  %v573_v17 = vsel %vm256_vm15, %v572_v19, %v547_v38  ;;  %v574_v45 = vrot.slane %v547_v38, 4 }
 0x488   :  { %v393_v48 = vsel %vm256_vm15, %v392_v24, %v375_v36  ;;  %v394_v50 = vrot.slane %v375_v36, 4  ;;  %v407_v51 = vsel %vm256_vm15, %v391_v1, %v406_v40  ;;  %v561_v7 = vsel %vm256_vm15, %v560_v26, %v543_v31 }
 0x489   :  { %v399_v22 = vperm.slane %v393_v48, %v2132_v52  ;;  %v415_v54 = vperm.slane %v407_v51, %v2132_v52  ;;  %v420_v58 = vrot.slane %v411_v41, 4  ;;  %v562_v3 = vrot.slane %v543_v31, 4 }
 0x48a   :  { %v395_v23 = vsel %vm256_vm15, %v387_v15, %v394_v50  ;;  %v567_v55 = vperm.slane %v561_v7, %v2132_v52  ;;  %v575_v59 = vsel %vm256_vm15, %v559_v2, %v574_v45  ;;  %v579_v61 = vperm.slane %v573_v17, %v2132_v52 }
 0x48b   :  { %v403_v57 = vperm.slane %v395_v23, %v2132_v52  ;;  %v416_v62 = vrot.slane %v399_v22, 4  ;;  %v421_v63 = vsel %vm256_vm15, 0.0, %v420_v58  ;;  %v422_v0 = vrot.slane %v415_v54, 4 }
 0x48c   :  { %v563_v46 = vsel %vm256_vm15, %v555_v37, %v562_v3  ;;  %v583_v5 = vperm.slane %v575_v59, %v2132_v52  ;;  %v584_v6 = vrot.slane %v567_v55, 4  ;;  %v588_v25 = vrot.slane %v579_v61, 4 }
 0x48d   :  { %v418_v21 = vrot.slane %v403_v57, 4  ;;  %v423_v42 = vsel %vm256_vm15, 0.0, %v422_v0  ;;  %v571_v49 = vperm.slane %v563_v46, %v2132_v52  ;;  %v417_v27 = vsel %vm256_vm15, 0.0, %v416_v62 }
 0x48e   :  { %v589_v13 = vsel %vm256_vm15, 0.0, %v588_v25  ;;  %v590_v1 = vrot.slane %v583_v5, 4  ;;  %v832_v2 = vrot.slane %v423_v42, 4  ;;  %v585_v28 = vsel %vm256_vm15, 0.0, %v584_v6 }
 0x48f   :  { %v586_v15 = vrot.slane %v571_v49, 4  ;;  %v419_v37 = vsel %vm256_vm15, 0.0, %v418_v21  ;;  %v816_v16 = vsel %vm256_vm15, %v418_v21, %v399_v22  ;;  %v827_v39 = vsel %vm256_vm15, %v422_v0, %v411_v41 }
 0x490   :  { %v591_v18 = vsel %vm256_vm15, 0.0, %v590_v1  ;;  %v881_v56 = vsel %vm256_vm15, %v590_v1, %v579_v61  ;;  %v820_v11 = vperm.slane %v816_v16, %v2115_v29  ;;  %v821_v12 = vrot.slane %v419_v37, 4 }
 0x491   :  { %v886_v32 = vrot.slane %v591_v18, 4  ;;  %v587_v19 = vsel %vm256_vm15, 0.0, %v586_v15  ;;  %v870_v34 = vsel %vm256_vm15, %v586_v15, %v567_v55  ;;  %v885_v38 = vperm.slane %v881_v56, %v2115_v29 }
 0x492   :  { %v874_v24 = vperm.slane %v870_v34, %v2115_v29  ;;  %v875_v26 = vrot.slane %v587_v19, 4  ;;  %v822_v33 = vsel %vm256_vm15, %v821_v12, %v417_v27  ;;  %v831_v10 = vperm.slane %v827_v39, %v2115_v29 }
 0x493   :  { %v887_v36 = vsel %vm256_vm15, %v886_v32, %v589_v13  ;;  %v906_v20 = vrot.slane %v885_v38, 4  ;;  %v826_v40 = vperm.slane %v822_v33, %v2115_v29  ;;  %v833_v31 = vsel %vm256_vm15, %v832_v2, %v421_v63 }
 0x494   :  { %v876_v41 = vsel %vm256_vm15, %v875_v26, %v585_v28  ;;  %v891_v17 = vperm.slane %v887_v36, %v2115_v29  ;;  %v894_v45 = vrot.slane %v874_v24, 4  ;;  %v837_v48 = vperm.slane %v833_v31, %v2115_v29 }
 0x495   :  { %v880_v50 = vperm.slane %v876_v41, %v2115_v29  ;;  %v840_v51 = vrot.slane %v820_v11, 4  ;;  %v852_v7 = vrot.slane %v831_v10, 4  ;;  %v838_v58 = vrot.slane %v826_v40, 4 }
 0x496   :  { %v907_v22 = vsel %vm256_vm15, %v891_v17, %v906_v20  ;;  %v904_v54 = vrot.slane %v891_v17, 4  ;;  %v850_v3 = vrot.slane %v837_v48, 4 }
 0x497   :  { %v895_v23 = vsel %vm256_vm15, %v880_v50, %v894_v45  ;;  %v915_v55 = vperm.slane %v907_v22, %v2132_v52  ;;  %v892_v59 = vrot.slane %v880_v50, 4  ;;  %v841_v61 = vsel %vm256_vm15, %v826_v40, %v840_v51 }
 0x498   :  { %v903_v57 = vperm.slane %v895_v23, %v2132_v52  ;;  %v905_v62 = vsel %vm256_vm15, %v904_v54, %v885_v38  ;;  %v849_v63 = vperm.slane %v841_v61, %v2132_v52  ;;  %v853_v0 = vsel %vm256_vm15, %v837_v48, %v852_v7 }
 0x499   :  { %v920_v46 = vrot.slane %v915_v55, 4  ;;  %v893_v5 = vsel %vm256_vm15, %v892_v59, %v874_v24  ;;  %v911_v6 = vperm.slane %v905_v62, %v2132_v52  ;;  %v861_v25 = vperm.slane %v853_v0, %v2132_v52 }
 0x49a   :  { %v899_v21 = vperm.slane %v893_v5, %v2132_v52  ;;  %v922_v42 = vrot.slane %v903_v57, 4  ;;  %v839_v49 = vsel %vm256_vm15, %v838_v58, %v820_v11  ;;  %v851_v27 = vsel %vm256_vm15, %v850_v3, %v831_v10 }
 0x49b   :  { %v921_v13 = vsel %vm256_vm15, %v920_v46, %v903_v57  ;;  %v916_v1 = vrot.slane %v911_v6, 4  ;;  %v866_v2 = vrot.slane %v861_v25, 4  ;;  %v845_v28 = vperm.slane %v839_v49, %v2132_v52 }
 0x49c   :  { %1346 = vmatpush.msra.mxu0 %v921_v13  ;;  %v923_v15 = vsel %vm256_vm15, %v915_v55, %v922_v42  ;;  %v857_v37 = vperm.slane %v851_v27, %v2132_v52  ;;  %v918_v16 = vrot.slane %v899_v21, 4  ;;  %v868_v39 = vrot.slane %v849_v63, 4 }
 0x49d   :  { %v917_v18 = vsel %vm256_vm15, %v916_v1, %v899_v21  ;;  %v867_v56 = vsel %vm256_vm15, %v866_v2, %v849_v63  ;;  %1375 = vmatpush.msrb.mxu1 %v923_v15  ;;  %v864_v11 = vrot.slane %v845_v28, 4 }
 0x49e   :  { %1288 = vmatpush.msrb.mxu2 %v917_v18  ;;  %1347 = vmatpush.msra.mxu0 %v867_v56  ;;  %v862_v12 = vrot.slane %v857_v37, 4  ;;  %v919_v32 = vsel %vm256_vm15, %v911_v6, %v918_v16  ;;  %v869_v19 = vsel %vm256_vm15, %v861_v25, %v868_v39 }
 0x49f   :  { %1317 = vmatpush.msrb.mxu3 %v919_v32  ;;  %1376 = vmatpush.msrb.mxu1 %v869_v19  ;;  %v865_v38 = vsel %vm256_vm15, %v857_v37, %v864_v11 }
 0x4a0   :  { %v863_v34 = vsel %vm256_vm15, %v862_v12, %v845_v28 }
 0x4a1   :  { %1289 = vmatpush.msrb.mxu2 %v863_v34  ;;  %1318 = vmatpush.msrb.mxu3 %v865_v38 }
 0x4d4   :  { %v1138_v24 = vpop.xlane.xlu1 %1137 }
 0x4d5   :  { %1920 = vrcp.f32 %v1138_v24  ;;  %v1217_v20 = vand.u32 2147483647, %v1138_v24  ;;  %v1219_v31 = vand.u32 2147483648, %v1138_v24  ;;  %vm1213_vm4 = vweird.f32 %v1138_v24 }
 0x4d7   :  { %vm2507_vm5 = vcmp.eq.f32.partialorder %v1217_v20, 8.507059e+37  ;;  %v1220_v7 = vor.u32 1.1754944e-38, %v1219_v31 }
 0x4d8   :  { %v1132_v26 = vpop.xlane.xlu0 %1131 }
 0x4d9   :  { %1922 = vrcp.f32 %v1132_v26  ;;  %v1187_v23 = vand.u32 2147483647, %v1132_v26  ;;  %v1189_v55 = vand.u32 2147483648, %v1132_v26  ;;  %vm1183_vm9 = vweird.f32 %v1132_v26 }
 0x4da   :  { %v1126_v33 = vpop.xlane.xlu2 %1125 }
 0x4db   :  { %v1921_v10 = vpop.eup %1920  ;;  %1924 = vrcp.f32 %v1126_v33  ;;  %v1159_v63 = vand.u32 2147483648, %v1126_v33  ;;  %v1190_v6 = vor.u32 1.1754944e-38, %v1189_v55  ;;  %v1157_v25 = vand.u32 2147483647, %v1126_v33 }
 0x4dc   :  { %v1209_v36 = vmul.f32 %v1921_v10, %v1138_v24  ;;  %vm1214_vm2 = vweird.f32 %v1921_v10  ;;  %vm1188_vm12 = vcmp.eq.f32.partialorder %v1187_v23, 8.507059e+37  ;;  %vm1153_vm13 = vweird.f32 %v1126_v33 }
 0x4dd   :  { %vm1215_vm6 = vmor %vm1213_vm4, %vm1214_vm2  ;;  %v1160_v2 = vor.u32 1.1754944e-38, %v1159_v63  ;;  %vm1158_vm2 = vcmp.eq.f32.partialorder %v1157_v25, 8.507059e+37 }
 0x4de   :  { %v1210_v40 = vsub.f32 1.0, %v1209_v36 }
 0x4df   :  { %v1923_v41 = vpop.eup %1922 }
 0x4e0   :  { %v1211_v17 = vmul.f32 %v1921_v10, %v1210_v40  ;;  %v1179_v45 = vmul.f32 %v1923_v41, %v1132_v26  ;;  %vm1184_vm8 = vweird.f32 %v1923_v41 }
 0x4e1   :  { %v1925_v48 = vpop.eup %1924  ;;  %vm1185_vm11 = vmor %vm1183_vm9, %vm1184_vm8 }
 0x4e2   :  { %v1212_v51 = vadd.f32 %v1921_v10, %v1211_v17  ;;  %v1180_v22 = vsub.f32 1.0, %v1179_v45  ;;  %v1149_v54 = vmul.f32 %v1925_v48, %v1126_v33  ;;  %v2511_v58 = vpop.xlane.xlu1 %1134  ;;  %v2513_v3 = vpop.xlane.xlu2 %1143  ;;  %vm1154_vm10 = vweird.f32 %v1925_v48 }
 0x4e3   :  { %1926 = vrcp.f32 %v2511_v58  ;;  %vm2524_vm14 = vmor %vm1153_vm13, %vm1154_vm10  ;;  %v1204_v56 = vand.u32 2147483648, %v2511_v58  ;;  %v1247_v11 = vand.u32 2147483647, %v2513_v3  ;;  %v1249_v19 = vand.u32 2147483648, %v2513_v3 }
 0x4e4   :  { %v1216_v59 = vsel %vm1215_vm6, %v1921_v10, %v1212_v51  ;;  %v1181_v61 = vmul.f32 %v1923_v41, %v1180_v22  ;;  %v1150_v57 = vsub.f32 1.0, %v1149_v54  ;;  %1928 = vrcp.f32 %v2513_v3 }
 0x4e5   :  { %v1221_v62 = vsel %vm2507_vm5, %v1220_v7, %v1216_v59  ;;  %v1202_v34 = vand.u32 2147483647, %v2511_v58  ;;  %vm1198_vm5 = vweird.f32 %v2511_v58  ;;  %vm1243_vm6 = vweird.f32 %v2513_v3 }
 0x4e6   :  { %v1182_v0 = vadd.f32 %v1923_v41, %v1181_v61  ;;  %v1151_v46 = vmul.f32 %v1925_v48, %v1150_v57  ;;  %v1222_v5 = vmul.f32 %v2394_v14, %v1221_v62  ;;  %v1205_v33 = vor.u32 1.1754944e-38, %v1204_v56 }
 0x4e7   :  { %vm2546_vm9 = vcmp.eq.f32.partialorder %v1247_v11, 8.507059e+37 }
 0x4e8   :  { %v1152_v21 = vadd.f32 %v1925_v48, %v1151_v46  ;;  %1838 = vmatmul.msk.f32.vlgmr.msra.gmra.mxu0 %vm1075_vm1, %v1222_v5  ;;  %v2522_v42 = vpop.xlane.xlu0 %1128  ;;  %v1186_v49 = vsel %vm1185_vm11, %v1923_v41, %v1182_v0  ;;  %v1250_v41 = vor.u32 1.1754944e-38, %v1249_v19  ;;  %vm1203_vm11 = vcmp.eq.f32.partialorder %v1202_v34, 8.507059e+37 }
 0x4e9   :  { %v1927_v27 = vpop.eup %1926  ;;  %1930 = vrcp.f32 %v2522_v42  ;;  %v1191_v14 = vsel %vm1188_vm12, %v1190_v6, %v1186_v49  ;;  %v1174_v45 = vand.u32 2147483648, %v2522_v42  ;;  %v1172_v22 = vand.u32 2147483647, %v2522_v42 }
 0x4ea   :  { %v1929_v1 = vpop.eup %1928  ;;  %v1194_v28 = vmul.f32 %v1927_v27, %v2511_v58  ;;  %v2530_v15 = vpop.xlane.xlu2 %1140  ;;  %v1192_v37 = vmul.f32 %v2398_v8, %v1191_v14  ;;  %v1156_v16 = vsel %vm2524_vm14, %v1925_v48, %v1152_v21  ;;  %vm1199_vm4 = vweird.f32 %v1927_v27 }
 0x4eb   :  { %v1239_v39 = vmul.f32 %v1929_v1, %v2513_v3  ;;  %1932 = vrcp.f32 %v2530_v15  ;;  %v1161_v12 = vsel %vm1158_vm2, %v1160_v2, %v1156_v16  ;;  %vm1244_vm8 = vweird.f32 %v1929_v1  ;;  %vm1200_vm10 = vmor %vm1198_vm5, %vm1199_vm4 }
 0x4ec   :  { %v1195_v18 = vsub.f32 1.0, %v1194_v28  ;;  %1836 = vmatmul.msk.f32.vlgmr.msrb.gmra.mxu3 %vm1075_vm1, %v1192_v37  ;;  %v1162_v8 = vmul.f32 %v2402_v35, %v1161_v12  ;;  %vm1245_vm12 = vmor %vm1243_vm6, %vm1244_vm8  ;;  %vm1168_vm14 = vweird.f32 %v2522_v42  ;;  %v1234_v55 = vand.u32 2147483648, %v2530_v15 }
 0x4ed   :  { %v1240_v32 = vsub.f32 1.0, %v1239_v39  ;;  %v1232_v62 = vand.u32 2147483647, %v2530_v15  ;;  %v1175_v0 = vor.u32 1.1754944e-38, %v1174_v45  ;;  %vm1228_vm4 = vweird.f32 %v2530_v15 }
 0x4ee   :  { %v1196_v38 = vmul.f32 %v1927_v27, %v1195_v18  ;;  %1834 = vmatmul.msk.f32.vlgmr.msrb.gmra.mxu2 %vm1075_vm1, %v1162_v8  ;;  %vm1173_vm6 = vcmp.eq.f32.partialorder %v1172_v22, 8.507059e+37 }
 0x4ef   :  { %v1931_v24 = vpop.eup %1930  ;;  %v1241_v26 = vmul.f32 %v1929_v1, %v1240_v32 }
 0x4f0   :  { %v1164_v35 = vmul.f32 %v1931_v24, %v2522_v42  ;;  %v1147_v36 = vpop.xlane.xlu0 %1146  ;;  %v1197_v20 = vadd.f32 %v1927_v27, %v1196_v38  ;;  %vm1169_vm13 = vweird.f32 %v1931_v24 }
 0x4f1   :  { %v1933_v40 = vpop.eup %1932  ;;  %v1242_v31 = vadd.f32 %v1929_v1, %v1241_v26  ;;  %1934 = vrcp.f32 %v1147_v36  ;;  %vm1170_vm5 = vmor %vm1168_vm14, %vm1169_vm13  ;;  %v1264_v49 = vand.u32 2147483648, %v1147_v36 }
 0x4f2   :  { %v1165_v17 = vsub.f32 1.0, %v1164_v35  ;;  %v1224_v48 = vmul.f32 %v1933_v40, %v2530_v15  ;;  %v1201_v50 = vsel %vm1200_vm10, %v1927_v27, %v1197_v20  ;;  %vm1229_vm2 = vweird.f32 %v1933_v40 }
 0x4f3   :  { %v1246_v51 = vsel %vm1245_vm12, %v1929_v1, %v1242_v31  ;;  %v1206_v7 = vsel %vm1203_vm11, %v1205_v33, %v1201_v50  ;;  %vm1230_vm8 = vmor %vm1228_vm4, %vm1229_vm2  ;;  %v1262_v1 = vand.u32 2147483647, %v1147_v36  ;;  %vm1258_vm11 = vweird.f32 %v1147_v36 }
 0x4f4   :  { %v1251_v54 = vsel %vm2546_vm9, %v1250_v41, %v1246_v51  ;;  %v1166_v58 = vmul.f32 %v1931_v24, %v1165_v17  ;;  %v1225_v3 = vsub.f32 1.0, %v1224_v48  ;;  %v1207_v23 = vmul.f32 %v2409_v44, %v1206_v7 }
 0x4f5   :  { %v1252_v59 = vmul.f32 %v2406_v43, %v1251_v54  ;;  %v1235_v43 = vor.u32 1.1754944e-38, %v1234_v55  ;;  %vm1233_vm9 = vcmp.eq.f32.partialorder %v1232_v62, 8.507059e+37  ;;  %v1265_v28 = vor.u32 1.1754944e-38, %v1264_v49 }
 0x4f6   :  { %v1226_v61 = vmul.f32 %v1933_v40, %v1225_v3  ;;  %1837 = vmatmul.msk.f32.gmra.mxu3 %vm1075_vm1, %v1207_v23  ;;  %v1167_v57 = vadd.f32 %v1931_v24, %v1166_v58  ;;  %vm1263_vm13 = vcmp.eq.f32.partialorder %v1262_v1, 8.507059e+37 }
 0x4f7   :  { %v1935_v63 = vpop.eup %1934  ;;  %1840 = vmatmul.msk.f32.vlgmr.msrb.gmra.mxu1 %vm1075_vm1, %v1252_v59 }
 0x4f8   :  { %v1254_v44 = vmul.f32 %v1935_v63, %v1147_v36  ;;  %v1171_v46 = vsel %vm1170_vm5, %v1931_v24, %v1167_v57  ;;  %v1227_v5 = vadd.f32 %v1933_v40, %v1226_v61  ;;  %vm1259_vm10 = vweird.f32 %v1935_v63 }
 0x4f9   :  { %v1176_v6 = vsel %vm1173_vm6, %v1175_v0, %v1171_v46  ;;  %vm1260_vm12 = vmor %vm1258_vm11, %vm1259_vm10 }
 0x4fa   :  { %v1255_v25 = vsub.f32 1.0, %v1254_v44  ;;  %v1177_v21 = vmul.f32 %v2417_v47, %v1176_v6  ;;  %v1231_v42 = vsel %vm1230_vm8, %v1933_v40, %v1227_v5 }
 0x4fb   :  { %v1236_v27 = vsel %vm1233_vm9, %v1235_v43, %v1231_v42 }
 0x4fc   :  { %v1256_v13 = vmul.f32 %v1935_v63, %v1255_v25  ;;  %1835 = vmatmul.msk.f32.gmra.mxu2 %vm1075_vm1, %v1177_v21  ;;  %v1237_v14 = vmul.f32 %v2415_v53, %v1236_v27 }
 0x4fe   :  { %1839 = vmatmul.msk.f32.gmra.mxu0 %vm1075_vm1, %v1237_v14  ;;  %v1257_v2 = vadd.f32 %v1935_v63, %v1256_v13 }
 0x500   :  { %v1261_v15 = vsel %vm1260_vm12, %v1935_v63, %v1257_v2 }
 0x501   :  { %v1266_v47 = vsel %vm1263_vm13, %v1265_v28, %v1261_v15 }
 0x502   :  { %v1267_v37 = vmul.f32 %v2423_v60, %v1266_v47 }
 0x504   :  { %1841 = vmatmul.msk.f32.gmra.mxu1 %vm1075_vm1, %v1267_v37 }
 0x565   :  { %v1349_v16 = vpop.f32.mrf.mxu0 }
 0x566   :  { %v1384_v18 = vrot.slane %v1349_v16, 4 }
 0x56f   :  { %v1320_v39 = vpop.f32.mrf.mxu3 }
 0x570   :  { %v1398_v53 = vrot.slane %v1320_v39, 4 }
 0x571   :  { %v1291_v56 = vpop.f32.mrf.mxu2 }
 0x572   :  { %v1385_v11 = vsel %vm256_vm15, %v1384_v18, %v1291_v56  ;;  %v1386_v12 = vrot.slane %v1291_v56, 4 }
 0x573   :  { %v1391_v32 = vperm.slane %v1385_v11, %v2115_v29 }
 0x574   :  { %v1378_v19 = vpop.f32.mrf.mxu1  ;;  %v1387_v8 = vsel %vm256_vm15, %v1349_v16, %v1386_v12 }
 0x575   :  { %v1396_v34 = vrot.slane %v1378_v19, 4  ;;  %v1399_v38 = vsel %vm256_vm15, %v1378_v19, %v1398_v53  ;;  %v1395_v60 = vperm.slane %v1387_v8, %v2115_v29  ;;  %v1410_v33 = vrot.slane %v1391_v32, 4 }
 0x576   :  { %v1407_v24 = vperm.slane %v1399_v38, %v2115_v29 }
 0x577   :  { %v1397_v26 = vsel %vm256_vm15, %v1396_v34, %v1320_v39  ;;  %v1422_v10 = vrot.slane %v1395_v60, 4 }
 0x578   :  { %v1403_v35 = vperm.slane %v1397_v26, %v2115_v29  ;;  %v1420_v36 = vrot.slane %v1407_v24, 4 }
 0x579   :  { %v1423_v41 = vsel %vm256_vm15, %v1407_v24, %v1422_v10  ;;  %v1323_v50 = vpop.f32.mrf.mxu3 }
 0x57a   :  { %v1408_v20 = vrot.slane %v1403_v35, 4  ;;  %v1411_v40 = vsel %vm256_vm15, %v1403_v35, %v1410_v33  ;;  %v1421_v31 = vsel %vm256_vm15, %v1420_v36, %v1395_v60  ;;  %v1431_v48 = vperm.slane %v1423_v41, %v2132_v52 }
 0x57b   :  { %v1419_v17 = vperm.slane %v1411_v40, %v2132_v52  ;;  %v1427_v45 = vperm.slane %v1421_v31, %v2132_v52  ;;  %v1352_v51 = vpop.f32.mrf.mxu0  ;;  %v1454_v55 = vrot.slane %v1323_v50, 4 }
 0x57c   :  { %v1409_v7 = vsel %vm256_vm15, %v1408_v20, %v1391_v32  ;;  %v1440_v22 = vrot.slane %v1352_v51, 4  ;;  %v1438_v23 = vrot.slane %v1431_v48, 4 }
 0x57d   :  { %v1415_v54 = vperm.slane %v1409_v7, %v2132_v52  ;;  %v1434_v58 = vrot.slane %v1419_v17, 4  ;;  %v1436_v3 = vrot.slane %v1427_v45, 4 }
 0x57e   :  { %v1439_v62 = vsel %vm256_vm15, 0.0, %v1438_v23  ;;  %v1507_v44 = vsel %vm256_vm15, %v1438_v23, %v1427_v45 }
 0x57f   :  { %v1432_v59 = vrot.slane %v1415_v54, 4  ;;  %v1435_v61 = vsel %vm256_vm15, 0.0, %v1434_v58  ;;  %v1437_v57 = vsel %vm256_vm15, 0.0, %v1436_v3  ;;  %v1294_v63 = vpop.f32.mrf.mxu2  ;;  %v1512_v46 = vrot.slane %v1439_v62, 4 }
 0x580   :  { %v1501_v0 = vrot.slane %v1435_v61, 4  ;;  %v1441_v5 = vsel %vm256_vm15, %v1440_v22, %v1294_v63  ;;  %v1442_v43 = vrot.slane %v1294_v63, 4  ;;  %v1496_v42 = vsel %vm256_vm15, %v1434_v58, %v1415_v54 }
 0x581   :  { %v1447_v6 = vperm.slane %v1441_v5, %v2115_v29  ;;  %v1381_v25 = vpop.f32.mrf.mxu1  ;;  %v1433_v21 = vsel %vm256_vm15, 0.0, %v1432_v59  ;;  %v1500_v13 = vperm.slane %v1496_v42, %v2115_v29  ;;  %v1511_v16 = vperm.slane %v1507_v44, %v2115_v29 }
 0x582   :  { %v1452_v49 = vrot.slane %v1381_v25, 4  ;;  %v1455_v27 = vsel %vm256_vm15, %v1381_v25, %v1454_v55  ;;  %v1502_v14 = vsel %vm256_vm15, %v1501_v0, %v1433_v21  ;;  %v1443_v1 = vsel %vm256_vm15, %v1352_v51, %v1442_v43 }
 0x583   :  { %v1466_v2 = vrot.slane %v1447_v6, 4  ;;  %v1463_v28 = vperm.slane %v1455_v27, %v2115_v29  ;;  %v1506_v15 = vperm.slane %v1502_v14, %v2115_v29  ;;  %v1451_v47 = vperm.slane %v1443_v1, %v2115_v29 }
 0x584   :  { %v1453_v37 = vsel %vm256_vm15, %v1452_v49, %v1323_v50  ;;  %v1513_v39 = vsel %vm256_vm15, %v1512_v46, %v1437_v57  ;;  %v1520_v11 = vrot.slane %v1500_v13, 4  ;;  %v1532_v32 = vrot.slane %v1511_v16, 4 }
 0x585   :  { %v1459_v18 = vperm.slane %v1453_v37, %v2115_v29  ;;  %v1476_v56 = vrot.slane %v1463_v28, 4  ;;  %v1517_v53 = vperm.slane %v1513_v39, %v2115_v29  ;;  %v1478_v12 = vrot.slane %v1451_v47, 4 }
 0x586   :  { %v1518_v19 = vrot.slane %v1506_v15, 4  ;;  %v1521_v60 = vsel %vm256_vm15, %v1506_v15, %v1520_v11 }
 0x587   :  { %v1464_v8 = vrot.slane %v1459_v18, 4  ;;  %v1467_v34 = vsel %vm256_vm15, %v1459_v18, %v1466_v2  ;;  %v1477_v38 = vsel %vm256_vm15, %v1476_v56, %v1451_v47  ;;  %v1479_v26 = vsel %vm256_vm15, %v1463_v28, %v1478_v12 }
 0x588   :  { %v1475_v24 = vperm.slane %v1467_v34, %v2132_v52  ;;  %v1483_v33 = vperm.slane %v1477_v38, %v2132_v52  ;;  %v1529_v10 = vperm.slane %v1521_v60, %v2132_v52  ;;  %v1487_v36 = vperm.slane %v1479_v26, %v2132_v52  ;;  %v1635_v26 = vld [vmem:[%s2736_s6 + $0x8] sm:$0xff] }
 0x589   :  { %v1465_v35 = vsel %vm256_vm15, %v1464_v8, %v1447_v6  ;;  %v1533_v20 = vsel %vm256_vm15, %v1517_v53, %v1532_v32  ;;  %v1519_v40 = vsel %vm256_vm15, %v1518_v19, %v1500_v13  ;;  %v1530_v7 = vrot.slane %v1517_v53, 4 }
 0x58a   :  { %v1471_v31 = vperm.slane %v1465_v35, %v2132_v52  ;;  %v1490_v41 = vrot.slane %v1475_v24, 4  ;;  %v1492_v17 = vrot.slane %v1483_v33, 4  ;;  %v1541_v45 = vperm.slane %v1533_v20, %v2132_v52  ;;  %v1636_v24 = vld [vmem:[%s2736_s6 + $0x10] sm:$0xff] }
 0x58b   :  { %v1494_v48 = vrot.slane %v1487_v36, 4  ;;  %v1548_v50 = vrot.slane %v1529_v10, 4  ;;  %v1525_v51 = vperm.slane %v1519_v40, %v2132_v52  ;;  %v1531_v63 = vsel %vm256_vm15, %v1530_v7, %v1511_v16  ;;  %v2679_v7 = vld [vmem:[%s2737_s7] sm:$0xff] }
 0x58c   :  { %v1488_v22 = vrot.slane %v1471_v31, 4  ;;  %v1491_v54 = vsel %vm256_vm15, 0.0, %v1490_v41  ;;  %v1493_v58 = vsel %vm256_vm15, 0.0, %v1492_v17  ;;  %v1550_v3 = vsel %vm256_vm15, %v1490_v41, %v1471_v31 }
 0x58d   :  { %v1495_v23 = vsel %vm256_vm15, 0.0, %v1494_v48  ;;  %v1555_v55 = vrot.slane %v1491_v54, 4  ;;  %v1561_v59 = vsel %vm256_vm15, %v1494_v48, %v1483_v33  ;;  %v1549_v61 = vsel %vm256_vm15, %v1541_v45, %v1548_v50  ;;  %v1634_v33 = vld [vmem:[%s2736_s6] sm:$0xff] }
 0x58e   :  { %v1566_v57 = vrot.slane %v1495_v23, 4  ;;  %1622 = vrot.lane.b32.xlu0 %v1549_v61, %s1984_s16  ;;  %v1546_v62 = vrot.slane %v1541_v45, 4  ;;  %v1544_v0 = vrot.slane %v1525_v51, 4  ;;  %v1537_v44 = vperm.slane %v1531_v63, %v2132_v52 }
 0x58f   :  { %v1489_v46 = vsel %vm256_vm15, 0.0, %v1488_v22  ;;  %v1554_v5 = vperm.slane %v1550_v3, %v2115_v29  ;;  %v1565_v43 = vperm.slane %v1561_v59, %v2115_v29  ;;  %v1646_v22 = vperm.slane %v2679_v7, 2 }
 0x590   :  { %v1547_v6 = vsel %vm256_vm15, %v1546_v62, %v1529_v10  ;;  %v1556_v25 = vsel %vm256_vm15, %v1555_v55, %v1489_v46  ;;  %v1567_v21 = vsel %vm256_vm15, %v1566_v57, %v1493_v58  ;;  %v1542_v42 = vrot.slane %v1537_v44, 4 }
 0x591   :  { %1614 = vrot.lane.b32.xlu2 %v1547_v6, %s1985_s1  ;;  %v1545_v49 = vsel %vm256_vm15, %v1537_v44, %v1544_v0  ;;  %v1560_v27 = vperm.slane %v1556_v25, %v2115_v29  ;;  %v1571_v13 = vperm.slane %v1567_v21, %v2115_v29  ;;  %v1574_v14 = vrot.slane %v1554_v5, 4  ;;  %v1640_v21 = vld [vmem:[%s2736_s6 + $0x30] sm:$0xff] }
 0x592   :  { %1606 = vrot.lane.b32.xlu1 %v1545_v49, %s1986_s17  ;;  %v1586_v1 = vrot.slane %v1565_v43, 4  ;;  %v1543_v15 = vsel %vm256_vm15, %v1542_v42, %v1525_v51 }
 0x593   :  { %v1572_v2 = vrot.slane %v1560_v27, 4  ;;  %v1584_v28 = vrot.slane %v1571_v13, 4  ;;  %v1575_v47 = vsel %vm256_vm15, %v1560_v27, %v1574_v14  ;;  %v1639_v27 = vld [vmem:[%s2736_s6 + $0x28] sm:$0xff]  ;;  %v1638_v14 = vld [vmem:[%s2736_s6 + $0x20] sm:$0xff] }
 0x594   :  { %v1587_v37 = vsel %vm256_vm15, %v1571_v13, %v1586_v1  ;;  %v1583_v16 = vperm.slane %v1575_v47, %v2132_v52  ;;  %v1645_v1 = vld [vmem:[%s2736_s6 + $0x58] sm:$0xff] }
 0x595   :  { %v1595_v39 = vperm.slane %v1587_v37, %v2132_v52  ;;  %v1573_v18 = vsel %vm256_vm15, %v1572_v2, %v1554_v5  ;;  %v1585_v29 = vsel %vm256_vm15, %v1584_v28, %v1565_v43  ;;  %v1644_v2 = vld [vmem:[%s2736_s6 + $0x50] sm:$0xff]  ;;  %1779 = vmatpush.msrb.mxu0 %v1645_v1 }
 0x596   :  { %v1579_v56 = vperm.slane %v1573_v18, %v2132_v52  ;;  %v1591_v53 = vperm.slane %v1585_v29, %v2132_v52  ;;  %v1602_v11 = vrot.slane %v1583_v16, 4  ;;  %v1637_v52 = vld [vmem:[%s2736_s6 + $0x18] sm:$0xff] }
 0x597   :  { %v1600_v12 = vrot.slane %v1595_v39, 4  ;;  %1665 = vmatpush.msra.mxu2 %v1637_v52  ;;  %1780 = vmatpush.msrb.mxu0 %v1644_v2 }
 0x598   :  { %v1596_v32 = vrot.slane %v1591_v53, 4  ;;  %v1598_v19 = vrot.slane %v1579_v56, 4  ;;  %v1603_v8 = vsel %vm256_vm15, %v1595_v39, %v1602_v11  ;;  %v1722_v11 = vperm.slane %v2679_v7, 3 }
 0x599   :  { %v1601_v34 = vsel %vm256_vm15, %v1600_v12, %v1583_v16  ;;  %1624 = vrot.lane.b32.xlu0 %v1603_v8, %s1984_s16  ;;  %1666 = vmatpush.msra.mxu2 %v1636_v24 }
 0x59a   :  { %1616 = vrot.lane.b32.xlu2 %v1601_v34, %s1985_s1  ;;  %v1599_v38 = vsel %vm256_vm15, %v1591_v53, %v1598_v19  ;;  %v1597_v60 = vsel %vm256_vm15, %v1596_v32, %v1579_v56  ;;  %s1800_s1 = sshll.u32 %s2738_s8, 4  ;;  %s1801_s1 = int_to_ptr.hbm [resolvable:$true] %s1800_s1 }
 0x59b   :  { %1608 = vrot.lane.b32.xlu1 %v1599_v38, %s1986_s17  ;;  %1667 = vmatpush.msra.mxu2 %v1635_v26 }
 0x59d   :  { %1668 = vmatpush.msra.mxu2 %v1634_v33 }
 0x5eb   :  { %v1615_v35 = vpop.permute.xlu2 %1614 }
 0x5f4   :  { %v1617_v17 = vpop.permute.xlu2 %1616 }
 0x600   :  { %v1623_v20 = vpop.permute.xlu0 %1622 }
 0x604   :  { %v1607_v10 = vpop.permute.xlu1 %1606 }
 0x605   :  { %v1628_v36 = vsel %vm934_vm0, %v1543_v15, %v1607_v10 }
 0x606   :  { %v1630_v40 = vsel %vm1075_vm1, %v1628_v36, %v1615_v35  ;;  %v1643_v36 = vld [vmem:[%s2736_s6 + $0x48] sm:$0xff] }
 0x607   :  { %v1632_v31 = vsel %vm61_vm3, %v1630_v40, %v1623_v20  ;;  %v1642_v20 = vld [vmem:[%s2736_s6 + $0x40] sm:$0xff]  ;;  %1781 = vmatpush.msrb.mxu0 %v1643_v36  ;;  %v1728_v40 = vperm.slane %v2679_v7, 5 }
 0x608   :  { %1842 = vmatmul.msk.f32.vlgmr.msra.gmra.mxu2 %vm92_vm7, %v1632_v31 }
 0x609   :  { %1782 = vmatpush.msrb.mxu0 %v1642_v20 }
 0x60b   :  { %v1625_v48 = vpop.permute.xlu0 %1624 }
 0x60d   :  { %v1609_v41 = vpop.permute.xlu1 %1608 }
 0x60e   :  { %v1629_v45 = vsel %vm934_vm0, %v1597_v60, %v1609_v41 }
 0x60f   :  { %v1631_v50 = vsel %vm1075_vm1, %v1629_v45, %v1617_v17 }
 0x610   :  { %v1633_v51 = vsel %vm61_vm3, %v1631_v50, %v1625_v48 }
 0x611   :  { %1843 = vmatmul.msk.f32.gmra.mxu2 %vm92_vm7, %v1633_v51  ;;  %v1760_v51 = vperm.slane %v2679_v7, 6 }
 0x68b   :  { %v1670_v54 = vpop.f32.mrf.mxu2 }
 0x68c   :  { %v1671_v58 = vadd.f32 %v1670_v54, %v1646_v22 }
 0x68e   :  { %v1676_v3 = vadd.f32 %v1671_v58, %v2082_v4 }
 0x690   :  { %v1678_v23 = vsel %vm92_vm7, %v1676_v3, 0.0 }
 0x691   :  { %1679 = vadd.xlane.f32.xlu1 %v1678_v23 }
 0x694   :  { %v1673_v55 = vpop.f32.mrf.mxu2 }
 0x695   :  { %v1674_v59 = vadd.f32 %v1673_v55, %v1646_v22 }
 0x697   :  { %v1677_v61 = vadd.f32 %v1674_v59, %v2086_v9  ;;  %v1641_v9 = vld [vmem:[%s2736_s6 + $0x38] sm:$0xff] }
 0x698   :  { %1747 = vmatpush.msra.mxu3 %v1641_v9 }
 0x699   :  { %v1681_v57 = vsel %vm92_vm7, %v1677_v61, 0.0 }
 0x69a   :  { %1682 = vadd.xlane.f32.xlu2 %v1681_v57  ;;  %1748 = vmatpush.msra.mxu3 %v1640_v21 }
 0x69c   :  { %1749 = vmatpush.msra.mxu3 %v1639_v27 }
 0x69e   :  { %1750 = vmatpush.msra.mxu3 %v1638_v14 }
 0x704   :  { %v1680_v62 = vpop.xlane.xlu1 %1679 }
 0x705   :  { %v1684_v63 = vmul.f32 %v1680_v62, %v2059_v30 }
 0x707   :  { %v1686_v0 = vsub.f32 %v1676_v3, %v1684_v63 }
 0x709   :  { %v1688_v44 = vmul.f32 %v1686_v0, %v1686_v0 }
 0x70b   :  { %v1690_v46 = vsel %vm92_vm7, %v1688_v44, 0.0 }
 0x70c   :  { %1691 = vadd.xlane.f32.xlu0 %v1690_v46 }
 0x70d   :  { %v1683_v5 = vpop.xlane.xlu2 %1682 }
 0x70e   :  { %v1685_v4 = vmul.f32 %v1683_v5, %v2059_v30 }
 0x710   :  { %v1687_v43 = vsub.f32 %v1677_v61, %v1685_v4 }
 0x712   :  { %v1689_v6 = vmul.f32 %v1687_v43, %v1687_v43 }
 0x714   :  { %v1693_v25 = vsel %vm92_vm7, %v1689_v6, 0.0 }
 0x715   :  { %1694 = vadd.xlane.f32.xlu1 %v1693_v25 }
 0x77f   :  { %v1692_v42 = vpop.xlane.xlu0 %1691 }
 0x780   :  { %v1696_v49 = vmul.f32 %v1692_v42, %v2059_v30 }
 0x782   :  { %v1698_v13 = vadd.f32 1e-05, %v1696_v49 }
 0x784   :  { %1936 = vrsqrt.f32 %v1698_v13  ;;  %vm1706_vm15 = vweird.f32 %v1698_v13 }
 0x788   :  { %v1695_v28 = vpop.xlane.xlu1 %1694 }
 0x789   :  { %v1697_v15 = vmul.f32 %v1695_v28, %v2059_v30  ;;  %v1725_v30 = vperm.slane %v2679_v7, 4 }
 0x78a   :  { %v1937_v47 = vpop.eup %1936 }
 0x78b   :  { %v1701_v37 = vmul.f32 %v1937_v47, %v1698_v13  ;;  %v1699_v16 = vadd.f32 1e-05, %v1697_v15  ;;  %vm1707_vm3 = vweird.f32 %v1937_v47 }
 0x78c   :  { %vm1708_vm0 = vmor %vm1706_vm15, %vm1707_vm3 }
 0x78d   :  { %v1702_v39 = vmul.f32 %v1937_v47, %v1701_v37  ;;  %1938 = vrsqrt.f32 %v1699_v16  ;;  %vm1716_vm14 = vweird.f32 %v1699_v16 }
 0x78f   :  { %v1703_v18 = vmul.f32 0.5, %v1702_v39 }
 0x791   :  { %v1704_v29 = vsub.f32 1.5, %v1703_v18 }
 0x793   :  { %v1939_v56 = vpop.eup %1938  ;;  %v1705_v53 = vmul.f32 %v1937_v47, %v1704_v29 }
 0x794   :  { %v1711_v12 = vmul.f32 %v1939_v56, %v1699_v16  ;;  %vm1717_vm1 = vweird.f32 %v1939_v56 }
 0x795   :  { %v1709_v32 = vsel %vm1708_vm0, %v1937_v47, %v1705_v53  ;;  %vm1718_vm2 = vmor %vm1716_vm14, %vm1717_vm1 }
 0x796   :  { %v1720_v19 = vmul.f32 %v1709_v32, %v1686_v0  ;;  %v1712_v8 = vmul.f32 %v1939_v56, %v1711_v12 }
 0x798   :  { %v1723_v34 = vmul.f32 %v1722_v11, %v1720_v19  ;;  %v1713_v38 = vmul.f32 0.5, %v1712_v8 }
 0x79a   :  { %v1714_v60 = vsub.f32 1.5, %v1713_v38  ;;  %v1726_v52 = vadd.f32 %v1725_v30, %v1723_v34 }
 0x79c   :  { %v1715_v24 = vmul.f32 %v1939_v56, %v1714_v60  ;;  %1844 = vmatmul.msk.f32.vlgmr.msra.gmra.mxu3 %vm92_vm7, %v1726_v52 }
 0x79e   :  { %v1719_v26 = vsel %vm1718_vm2, %v1939_v56, %v1715_v24 }
 0x79f   :  { %v1721_v33 = vmul.f32 %v1719_v26, %v1687_v43 }
 0x7a1   :  { %v1724_v10 = vmul.f32 %v1722_v11, %v1721_v33 }
 0x7a3   :  { %v1727_v35 = vadd.f32 %v1725_v30, %v1724_v10 }
 0x7a5   :  { %1845 = vmatmul.msk.f32.gmra.mxu3 %vm92_vm7, %v1727_v35 }
 0x81f   :  { %v1752_v31 = vpop.f32.mrf.mxu3 }
 0x820   :  { %v1753_v41 = vadd.f32 %v1752_v31, %v1728_v40 }
 0x822   :  { %v1758_v17 = vmax.f32 %v1753_v41, 0.0 }
 0x824   :  { %1846 = vmatmul.msk.f32.vlgmr.msrb.gmra.mxu0 %vm92_vm7, %v1758_v17 }
 0x828   :  { %v1755_v45 = vpop.f32.mrf.mxu3 }
 0x829   :  { %v1756_v48 = vadd.f32 %v1755_v45, %v1728_v40 }
 0x82b   :  { %v1759_v50 = vmax.f32 %v1756_v48, 0.0 }
 0x82d   :  { %1847 = vmatmul.msk.f32.gmra.mxu0 %vm92_vm7, %v1759_v50 }
 0x8a1   :  { %v1784_v22 = vpop.f32.mrf.mxu0 }
 0x8a2   :  { %v1785_v54 = vadd.f32 %v1784_v22, %v1760_v51 }
 0x8a4   :  { %v1790_v58 = vadd.f32 %v1785_v54, %v1726_v52 }
 0x8a6   :  { %1792 = vst.msk [vmem:[#allocation2] sm:$0xff] %vm92_vm7, %v1790_v58 }
 0x8aa   :  { %v1787_v3 = vpop.f32.mrf.mxu0 }
 0x8ab   :  { %v1788_v23 = vadd.f32 %v1787_v3, %v1760_v51 }
 0x8ad   :  { %v1791_v55 = vadd.f32 %v1788_v23, %v1727_v35 }
 0x8af   :  { %1793 = vst.msk [vmem:[#allocation2 + $0x8] sm:$0xff] %vm92_vm7, %v1791_v55 }
 0x8b0   :  { %1806 = dma.vmem_to_hbm [thread:$0]  %s1799_s19, 256, %s1801_s1, [#allocation3], %s1988_s20, %s1988_s20, %s1986_s17  }
 0x8b1   :  { %1965 = dma.done.wait [#allocation3], 256  }
 0x8b2   :  { %1966 = vsyncadd [#allocation3], 4294967040 }
 0x8b3   :  { %1811 = vsyncpa [#allocation3], 1 }

</bundles_post_ra>
